<compile_context>
chip_gen: v7x
topology: tpu7x:2x2x1
jax: 0.10.0
libtpu: 0.0.40
codegen_flags: <defaults>
</compile_context>

<pallas_src>
import functools
import inspect

import jax
import jax.numpy as jnp
from jax import lax
from jax.experimental import pallas as pl
from jax.experimental.pallas import tpu as pltpu

CELEBA_ATTRS = ('male,smiling,eyeglasses,young,bald,rosy_cheeks,mustache,'
                'wavy_hair,blond_hair,heavy_makeup,attractive,bags_under_eyes,'
                'big_lips,blurry').split(',')

_SUPPORTS_PIPELINE_MODE = (
    'pipeline_mode' in inspect.signature(pl.BlockSpec).parameters)


def _spec(shape, index_map, buffers=None):
    """BlockSpec helper: optionally request an explicit buffer count."""
    if buffers is not None and _SUPPORTS_PIPELINE_MODE:
        return pl.BlockSpec(shape, index_map, pipeline_mode=pl.Buffered(buffers))
    return pl.BlockSpec(shape, index_map)


# ----------------------------- Pallas kernel -------------------------------
def _face_kernel(patches_ref, wconv_ref, bconv_ref, whead_ref, bhead_ref,
                 out_ref, acc_ref, *, block_b, block_p, inv_p):
    # Grid = (batch tiles [parallel], P tiles [arbitrary / reduction]).
    j = pl.program_id(1)

    # Conv for this (B samples x Pt positions) tile as one bf16 MXU matmul.
    h = jnp.dot(patches_ref[...], wconv_ref[...],
                preferred_element_type=jnp.float32)            # (B*Pt, ACpad) f32
    h = jnp.maximum(h + bconv_ref[...], 0.0)                   # bias + ReLU

    # Partial global-average-pool: tile-aligned reshape + sublane reduce
    # (replaces the previous dense (B, B*P) f32 pooling matmul).
    partial = jnp.sum(h.reshape(block_b, block_p, h.shape[-1]), axis=1)  # (B, ACpad)

    @pl.when(j == 0)
    def _():
        acc_ref[...] = jnp.zeros_like(acc_ref)

    acc_ref[...] += partial

    @pl.when(j == pl.num_programs(1) - 1)
    def _():
        pooled = (acc_ref[...] * inv_p).astype(jnp.bfloat16)   # (B, ACpad)
        scores = jnp.dot(pooled, whead_ref[...],
                         preferred_element_type=jnp.float32) + bhead_ref[...]
        out_ref[...] = scores                                  # (B, 128) lane-dense


# ------------------------------ glue (JAX) ---------------------------------
def _extract_patches(x_nhwc, ksize=3, stride=2, pad=1):
    """im2col: (N,H,W,C) -> (N, P, ksize*ksize*C), feature order (kh, kw, cin)."""
    n, h, w, c = x_nhwc.shape
    oh = (h + 2 * pad - ksize) // stride + 1
    ow = (w + 2 * pad - ksize) // stride + 1
    xp = jnp.pad(x_nhwc, ((0, 0), (pad, pad), (pad, pad), (0, 0)))
    cols = []
    for kh in range(ksize):
        for kw in range(ksize):
            cols.append(xp[:, kh:kh + stride * oh:stride,
                           kw:kw + stride * ow:stride, :])
    patches = jnp.stack(cols, axis=3)                          # (N, oh, ow, k*k, C)
    return patches.reshape(n, oh * ow, ksize * ksize * c), oh, ow


def init_params(key, num_attrs, cin=3, chid=32, ksize=3):
    kc, kb, kw, khb = jax.random.split(key, 4)
    return {
        'wconv': 0.1 * jax.random.normal(kc, (num_attrs, ksize, ksize, cin, chid), jnp.float32),
        'bconv': 0.1 * jax.random.normal(kb, (num_attrs, chid), jnp.float32),
        'whead': 0.1 * jax.random.normal(kw, (num_attrs, chid), jnp.float32),
        'bhead': 0.1 * jax.random.normal(khb, (num_attrs,), jnp.float32),
    }


def multiclass_face_predictor(x_nchw, params, input_size=16, batch_tile=64,
                              max_block_rows=4096):
    """Forward of MulticlassFacePredictor: (N, 3, H, W) in (-1,1) -> (N, A)."""
    n, c, h, w = x_nchw.shape
    # FacePredictor.__call__: bilinear resize (align_corners=False) when needed.
    if w != input_size or h != input_size:
        x_nchw = jax.image.resize(x_nchw, (n, c, input_size, input_size),
                                  method='bilinear')
    x_nhwc = jnp.transpose(x_nchw, (0, 2, 3, 1))

    A, kh_, kw_, cin, chid = params['wconv'].shape
    K = kh_ * kw_ * cin
    Kp = 8 * ((K + 7) // 8)                 # 27 -> 32 (sublane pad only, not 128)
    AC = A * chid
    ACpad = 128 * ((AC + 127) // 128)       # lane-dense intermediate width
    Apad = 128                              # lane-dense output width

    patches, oh, ow = _extract_patches(x_nhwc, ksize=kh_, stride=2, pad=1)
    P = oh * ow

    # --- samples per grid step B (amortize ~0.35us/step grid overhead) -----
    npad8 = 8 * pl.cdiv(n, 8)
    B = max(8, 8 * (min(batch_tile, npad8) // 8))
    if npad8 // B < 2 and npad8 >= 16:
        # Prefer >= 2 batch steps so both v7x TensorCores get work.
        B = max(8, 8 * ((npad8 // 2) // 8))
    n_pad = B * pl.cdiv(n, B)
    nbs = n_pad // B                        # batch grid steps

    # --- P tile so the (B*Pt, ACpad) f32 intermediate stays a few MiB ------
    pt_cap = max(1, max_block_rows // B)
    if P <= pt_cap:
        Pt = P
    else:
        Pt = pt_cap
        while P % Pt:                       # largest divisor of P <= pt_cap
            Pt -= 1
    nps = P // Pt                           # P grid steps (reduction axis)
    BPt = B * Pt

    # Patches: (n_pad, P, Kp) -> blocks of (B samples x Pt positions) contiguous rows.
    patches = jnp.pad(patches, ((0, n_pad - n), (0, 0), (0, Kp - K)))
    patches = jnp.transpose(patches.reshape(nbs, B, nps, Pt, Kp), (0, 2, 1, 3, 4))
    patches2d = patches.reshape(nbs * nps * BPt, Kp).astype(jnp.bfloat16)

    # Stack all attribute conv filters lane-dense: (Kp, ACpad), bf16.
    wconv = params['wconv'].reshape(A, K, chid)
    wconv = jnp.pad(wconv, ((0, 0), (0, Kp - K), (0, 0)))
    wconv_stacked = jnp.transpose(wconv, (1, 0, 2)).reshape(Kp, AC)
    wconv_stacked = jnp.pad(wconv_stacked,
                            ((0, 0), (0, ACpad - AC))).astype(jnp.bfloat16)
    bconv_stacked = jnp.pad(params['bconv'].reshape(1, AC),
                            ((0, 0), (0, ACpad - AC)))

    # Block-diagonal head, lane-dense 128 output columns, bf16.
    rows = jnp.arange(AC)
    cols = jnp.repeat(jnp.arange(A), chid)
    whead_block = jnp.zeros((ACpad, Apad), jnp.float32).at[rows, cols].set(
        params['whead'].reshape(-1)).astype(jnp.bfloat16)
    bhead = jnp.pad(params['bhead'].reshape(1, A), ((0, 0), (0, Apad - A)))

    # --- VMEM budget (explicit limit once B / P tiles are scaled up) -------
    vmem_bytes = (3 * BPt * Kp * 2                 # patch tile, up to 3 buffers (bf16)
                  + BPt * ACpad * 4                # conv/relu intermediate (f32)
                  + Kp * ACpad * 2 + ACpad * 4     # wconv / bconv (single-buffered)
                  + ACpad * Apad * 2 + Apad * 4    # whead / bhead (single-buffered)
                  + B * ACpad * 4                  # GAP accumulator scratch
                  + 2 * B * Apad * 4)              # double-buffered output tile
    vmem_limit = int(max(32 * 2**20, min(64 * 2**20, 2 * vmem_bytes)))

    cost = pl.CostEstimate(
        flops=2 * n_pad * P * Kp * ACpad           # conv matmul
              + n_pad * P * ACpad                  # bias/ReLU + GAP reduce
              + 2 * n_pad * ACpad * Apad,          # head matmul
        transcendentals=0,
        bytes_accessed=int(patches2d.size * 2 + wconv_stacked.size * 2
                           + whead_block.size * 2
                           + (bconv_stacked.size + bhead.size) * 4
                           + n_pad * Apad * 4),
    )

    kernel = functools.partial(_face_kernel, block_b=B, block_p=Pt, inv_p=1.0 / P)
    patch_buffers = 3 if (nbs * nps) >= 4 else None   # deeper pipeline when useful

    out = pl.pallas_call(
        kernel,
        out_shape=jax.ShapeDtypeStruct((n_pad, Apad), jnp.float32),
        grid_spec=pltpu.PrefetchScalarGridSpec(
            num_scalar_prefetch=0,
            grid=(nbs, nps),
            in_specs=[
                _spec((BPt, Kp), lambda i, j: (i * nps + j, 0), patch_buffers),
                _spec((Kp, ACpad), lambda i, j: (0, 0), 1),     # grid-invariant
                _spec((1, ACpad), lambda i, j: (0, 0), 1),      # grid-invariant
                _spec((ACpad, Apad), lambda i, j: (0, 0), 1),   # grid-invariant
                _spec((1, Apad), lambda i, j: (0, 0), 1),       # grid-invariant
            ],
            out_specs=pl.BlockSpec((B, Apad), lambda i, j: (i, 0)),
            scratch_shapes=[pltpu.VMEM((B, ACpad), jnp.float32)],
        ),
        compiler_params=pltpu.CompilerParams(
            dimension_semantics=("parallel", "arbitrary"),
            vmem_limit_bytes=vmem_limit),
        cost_estimate=cost,
    )(patches2d, wconv_stacked, bconv_stacked, whead_block, bhead)
    return out[:n, :A]


# -------------------------- pure-JAX reference ------------------------------
def reference_forward(x_nchw, params, input_size):
    n, c, h, w = x_nchw.shape
    if w != input_size or h != input_size:
        x_nchw = jax.image.resize(x_nchw, (n, c, input_size, input_size),
                                  method='bilinear')
    x = jnp.transpose(x_nchw, (0, 2, 3, 1))
    A = params['wconv'].shape[0]
    outs = []
    for a in range(A):
        y = lax.conv_general_dilated(
            x, params['wconv'][a], window_strides=(2, 2),
            padding=((1, 1), (1, 1)),
            dimension_numbers=('NHWC', 'HWIO', 'NHWC'))
        y = jnp.maximum(y + params['bconv'][a], 0.0)
        pooled = jnp.mean(y, axis=(1, 2))                      # (N, C)
        outs.append(pooled @ params['whead'][a] + params['bhead'][a])
    return jnp.stack(outs, axis=1)                             # (N, A)


if __name__ == "__main__":
    key = jax.random.PRNGKey(0)
    kx, kp = jax.random.split(key)

    N, CIN, INPUT_SIZE = 2, 3, 16        # scaled-down from the real 256x256
    x = jax.random.uniform(kx, (N, CIN, INPUT_SIZE, INPUT_SIZE),
                           jnp.float32, minval=-1.0, maxval=1.0)
    params = init_params(kp, num_attrs=len(CELEBA_ATTRS), cin=CIN, chid=32)

    out = multiclass_face_predictor(x, params, input_size=INPUT_SIZE)
    out = jax.block_until_ready(out)
    assert out.shape == (N, len(CELEBA_ATTRS)), out.shape
    ref = reference_forward(x, params, INPUT_SIZE)
    # bf16 conv + bf16 head matmul inputs (f32 accumulation) -> loose tolerance.
    assert jnp.allclose(out, ref, atol=2e-2, rtol=2e-2), (out, ref)

    # Also exercise the multi-step (batch tiles x P tiles) accumulation path.
    x2 = jax.random.uniform(jax.random.PRNGKey(1),
                            (20, CIN, INPUT_SIZE, INPUT_SIZE),
                            jnp.float32, minval=-1.0, maxval=1.0)
    out2 = jax.block_until_ready(
        multiclass_face_predictor(x2, params, input_size=INPUT_SIZE,
                                  batch_tile=8, max_block_rows=128))
    ref2 = reference_forward(x2, params, INPUT_SIZE)
    assert out2.shape == ref2.shape, (out2.shape, ref2.shape)
    assert jnp.allclose(out2, ref2, atol=2e-2, rtol=2e-2), (out2, ref2)

    print("KERNEL_OK")
</pallas_src>

<mosaic_0001>
module attributes {stable_mosaic.version = 11 : i64} {
  func.func @_face_kernel(%arg0: i32, %arg1: i32, %arg2: memref<512x32xbf16, #tpu.memory_space<vmem>>, %arg3: memref<32x512xbf16, #tpu.memory_space<vmem>>, %arg4: memref<1x512xf32, #tpu.memory_space<vmem>>, %arg5: memref<512x128xbf16, #tpu.memory_space<vmem>>, %arg6: memref<1x128xf32, #tpu.memory_space<vmem>>, %arg7: memref<8x128xf32, #tpu.memory_space<vmem>>, %arg8: memref<8x512xf32, #tpu.memory_space<vmem>>) attributes {dimension_semantics = [#tpu.dimension_semantics<parallel>, #tpu.dimension_semantics<arbitrary>], iteration_bounds = array<i64: 1, 1>, scalar_prefetch = 0 : i64, scratch_operands = 1 : i64, tpu.core_type = #tpu.core_type<tc>, window_params = [{transform_indices = @transform_0, window_bounds = array<i64: 512, 32>}, {pipeline_mode = #tpu.pipeline_mode<synchronous>, transform_indices = @transform_1, window_bounds = array<i64: 32, 512>}, {pipeline_mode = #tpu.pipeline_mode<synchronous>, transform_indices = @transform_2, window_bounds = array<i64: 1, 512>}, {pipeline_mode = #tpu.pipeline_mode<synchronous>, transform_indices = @transform_3, window_bounds = array<i64: 512, 128>}, {pipeline_mode = #tpu.pipeline_mode<synchronous>, transform_indices = @transform_4, window_bounds = array<i64: 1, 128>}, {transform_indices = @transform_5, window_bounds = array<i64: 8, 128>}]} {
    %c0 = arith.constant 0 : index
    %c0_0 = arith.constant 0 : index
    %0 = vector.load %arg2[%c0, %c0_0] : memref<512x32xbf16, #tpu.memory_space<vmem>>, vector<512x32xbf16>
    %c0_1 = arith.constant 0 : index
    %c0_2 = arith.constant 0 : index
    %1 = vector.load %arg3[%c0_1, %c0_2] : memref<32x512xbf16, #tpu.memory_space<vmem>>, vector<32x512xbf16>
    %cst = arith.constant dense<0.000000e+00> : vector<512x512xf32>
    %2 = tpu.matmul %0, %1, %cst {dimension_numbers = #tpu.dot_dimension_numbers<[1], [0], [0], [1], [0, 0, 1, 1], [], []>} : vector<512x32xbf16>, vector<32x512xbf16>, vector<512x512xf32> -> vector<512x512xf32>
    %c0_3 = arith.constant 0 : index
    %c0_4 = arith.constant 0 : index
    %3 = vector.load %arg4[%c0_3, %c0_4] : memref<1x512xf32, #tpu.memory_space<vmem>>, vector<1x512xf32>
    %4 = vector.broadcast %3 : vector<1x512xf32> to vector<512x512xf32>
    %5 = arith.addf %2, %4 : vector<512x512xf32>
    %cst_5 = arith.constant 0.000000e+00 : f32
    %6 = vector.broadcast %cst_5 : f32 to vector<512x512xf32>
    %7 = arith.maximumf %5, %6 : vector<512x512xf32>
    %8 = vector.shape_cast %7 : vector<512x512xf32> to vector<8x64x512xf32>
    %cst_6 = arith.constant dense<0.000000e+00> : vector<8x512xf32>
    %9 = vector.multi_reduction <add>, %8, %cst_6 [1] : vector<8x64x512xf32> to vector<8x512xf32>
    %c0_i32 = arith.constant 0 : i32
    %10 = arith.cmpi eq, %arg1, %c0_i32 : i32
    %11 = arith.extui %10 : i1 to i32
    %c0_i32_7 = arith.constant 0 : i32
    %12 = arith.cmpi ne, %11, %c0_i32_7 : i32
    scf.if %12 {
      %cst_14 = arith.constant 0.000000e+00 : f32
      %19 = vector.broadcast %cst_14 : f32 to vector<8x512xf32>
      %c0_15 = arith.constant 0 : index
      %c0_16 = arith.constant 0 : index
      %20 = vector.load %arg8[%c0_15, %c0_16] : memref<8x512xf32, #tpu.memory_space<vmem>>, vector<8x512xf32>
      tpu.vector_store %arg8[%c0_15, %c0_16], %19 {strides = array<i32>} : memref<8x512xf32, #tpu.memory_space<vmem>>, vector<8x512xf32>,
    } else {
    }
    %c0_8 = arith.constant 0 : index
    %c0_9 = arith.constant 0 : index
    %13 = vector.load %arg8[%c0_8, %c0_9] : memref<8x512xf32, #tpu.memory_space<vmem>>, vector<8x512xf32>
    %14 = arith.addf %13, %9 : vector<8x512xf32>
    %c0_10 = arith.constant 0 : index
    %c0_11 = arith.constant 0 : index
    %15 = vector.load %arg8[%c0_10, %c0_11] : memref<8x512xf32, #tpu.memory_space<vmem>>, vector<8x512xf32>
    tpu.vector_store %arg8[%c0_10, %c0_11], %14 {strides = array<i32>} : memref<8x512xf32, #tpu.memory_space<vmem>>, vector<8x512xf32>,
    %c0_i32_12 = arith.constant 0 : i32
    %16 = arith.cmpi eq, %arg1, %c0_i32_12 : i32
    %17 = arith.extui %16 : i1 to i32
    %c0_i32_13 = arith.constant 0 : i32
    %18 = arith.cmpi ne, %17, %c0_i32_13 : i32
    scf.if %18 {
      %c0_14 = arith.constant 0 : index
      %c0_15 = arith.constant 0 : index
      %19 = vector.load %arg8[%c0_14, %c0_15] : memref<8x512xf32, #tpu.memory_space<vmem>>, vector<8x512xf32>
      %cst_16 = arith.constant 1.562500e-02 : f32
      %20 = vector.broadcast %cst_16 : f32 to vector<8x512xf32>
      %21 = arith.mulf %19, %20 : vector<8x512xf32>
      %22 = arith.truncf %21 : vector<8x512xf32> to vector<8x512xbf16>
      %c0_17 = arith.constant 0 : index
      %c0_18 = arith.constant 0 : index
      %23 = vector.load %arg5[%c0_17, %c0_18] : memref<512x128xbf16, #tpu.memory_space<vmem>>, vector<512x128xbf16>
      %cst_19 = arith.constant dense<0.000000e+00> : vector<8x128xf32>
      %24 = tpu.matmul %22, %23, %cst_19 {dimension_numbers = #tpu.dot_dimension_numbers<[1], [0], [0], [1], [0, 0, 1, 1], [], []>} : vector<8x512xbf16>, vector<512x128xbf16>, vector<8x128xf32> -> vector<8x128xf32>
      %c0_20 = arith.constant 0 : index
      %c0_21 = arith.constant 0 : index
      %25 = vector.load %arg6[%c0_20, %c0_21] : memref<1x128xf32, #tpu.memory_space<vmem>>, vector<1x128xf32>
      %26 = vector.broadcast %25 : vector<1x128xf32> to vector<8x128xf32>
      %27 = arith.addf %24, %26 : vector<8x128xf32>
      %c0_22 = arith.constant 0 : index
      %c0_23 = arith.constant 0 : index
      %28 = vector.load %arg7[%c0_22, %c0_23] : memref<8x128xf32, #tpu.memory_space<vmem>>, vector<8x128xf32>
      tpu.vector_store %arg7[%c0_22, %c0_23], %27 {strides = array<i32>} : memref<8x128xf32, #tpu.memory_space<vmem>>, vector<8x128xf32>,
    } else {
    }
    return
  }
  func.func @transform_0(%arg0: i32, %arg1: i32) -> (i32, i32) {
    %c1_i32 = arith.constant 1 : i32
    %0 = arith.muli %arg0, %c1_i32 : i32
    %1 = arith.addi %0, %arg1 : i32
    %c0_i32 = arith.constant 0 : i32
    %c0_i32_0 = arith.constant 0 : i32
    return %1, %c0_i32 : i32, i32
  }
  func.func @transform_1(%arg0: i32, %arg1: i32) -> (i32, i32) {
    %c0_i32 = arith.constant 0 : i32
    %c0_i32_0 = arith.constant 0 : i32
    %c0_i32_1 = arith.constant 0 : i32
    return %c0_i32, %c0_i32_0 : i32, i32
  }
  func.func @transform_2(%arg0: i32, %arg1: i32) -> (i32, i32) {
    %c0_i32 = arith.constant 0 : i32
    %c0_i32_0 = arith.constant 0 : i32
    %c0_i32_1 = arith.constant 0 : i32
    return %c0_i32, %c0_i32_0 : i32, i32
  }
  func.func @transform_3(%arg0: i32, %arg1: i32) -> (i32, i32) {
    %c0_i32 = arith.constant 0 : i32
    %c0_i32_0 = arith.constant 0 : i32
    %c0_i32_1 = arith.constant 0 : i32
    return %c0_i32, %c0_i32_0 : i32, i32
  }
  func.func @transform_4(%arg0: i32, %arg1: i32) -> (i32, i32) {
    %c0_i32 = arith.constant 0 : i32
    %c0_i32_0 = arith.constant 0 : i32
    %c0_i32_1 = arith.constant 0 : i32
    return %c0_i32, %c0_i32_0 : i32, i32
  }
  func.func @transform_5(%arg0: i32, %arg1: i32) -> (i32, i32) {
    %c0_i32 = arith.constant 0 : i32
    %c0_i32_0 = arith.constant 0 : i32
    return %arg0, %c0_i32 : i32, i32
  }
}

</mosaic_0001>

<bundles_post_ra>
// kernel: tpu_custom_call.1
= control target key start
LH: loop header
LB: loop body
LE: loop exit
PB: predicated region body
PF: predicated region fallthrough
CT: control target
= control target key end

     0   :  { %v2566_v2 = vmov 0   ;;  %vm338_vm0 = vcmask 261120   ;;  %s3354_s0 = inlined_call_operand.vmem [shape: bf16[512,32], index: 0, kind: input, shape index: {}]   ;;  %s3355_s1 = inlined_call_operand.vmem [shape: bf16[32,512], index: 1, kind: input, shape index: {}]   ;;  %s3356_s2 = inlined_call_operand.vmem [shape: f32[1,512], index: 2, kind: input, shape index: {}]   ;;  %s3357_s3 = inlined_call_operand.vmem [shape: bf16[512,128], index: 3, kind: input, shape index: {}]   ;;  %s3358_s4 = inlined_call_operand.vmem [shape: f32[1,128], index: 4, kind: input, shape index: {}]   ;;  %s3359_s5 = inlined_call_operand.hbm [shape: f32[8,128], index: 5, kind: output, shape index: {}]  }
   0x1   :  { %v2466_v0 = vld [vmem:[%s3355_s1 + $0x4] ss:$16 sps:$4 sm:$0xff]   ;;  %v2468_v1 = vld [vmem:[%s3355_s1 + $0xc] ss:$16 sps:$4 sm:$0xff]   ;;  %467 = vmatprep.mubr.bf16.mxu0 %v2566_v2  ;;  %820 = vmatprep.mubr.bf16.mxu1 %v2566_v2  ;;  %v2470_v3 = vld [vmem:[%s3355_s1] ss:$16 sps:$4 sm:$0xff]  }
   0x2   :  { %435 = vmatprep.subr.bf16.mxu0 %v2466_v0  ;;  %v2471_v4 = vld [vmem:[%s3355_s1 + $0x8] ss:$16 sps:$4 sm:$0xff]   ;;  %788 = vmatprep.subr.bf16.mxu1 %v2468_v1  ;;  %v2472_v5 = vld [vmem:[%s3355_s1 + $0x24] ss:$16 sps:$4 sm:$0xff]   ;;  %v2474_v6 = vld [vmem:[%s3355_s1 + $0x2c] ss:$16 sps:$4 sm:$0xff]  }
   0x3   :  { %436 = vmatpush1.bf16.msra.mxu0 %v2470_v3  ;;  %789 = vmatpush1.bf16.msra.mxu1 %v2471_v4  ;;  %v2476_v7 = vld [vmem:[%s3355_s1 + $0x20] ss:$16 sps:$4 sm:$0xff]   ;;  %v2477_v8 = vld [vmem:[%s3355_s1 + $0x28] ss:$16 sps:$4 sm:$0xff]  }
   0x4   :  { %437 = vmatprep.subr.bf16.mxu0 %v2472_v5  ;;  %790 = vmatprep.subr.bf16.mxu1 %v2474_v6  ;;  %v2478_v9 = vld [vmem:[%s3354_s0] sm:$0xff]   ;;  %v2479_v10 = vld [vmem:[%s3354_s0 + $0x8] sm:$0xff]   ;;  %v2480_v11 = vld [vmem:[%s3354_s0 + $0x10] sm:$0xff]  }
   0x5   :  { %v2481_v12 = vld [vmem:[%s3354_s0 + $0x18] sm:$0xff]   ;;  %v2482_v13 = vld [vmem:[%s3354_s0 + $0x20] sm:$0xff]   ;;  %v2483_v14 = vld [vmem:[%s3354_s0 + $0x28] sm:$0xff]  }
   0x6   :  { %v2484_v15 = vld [vmem:[%s3354_s0 + $0x30] sm:$0xff]  }
   0x7   :  { %438 = vmatpush1.bf16.msra.mxu0 %v2476_v7  ;;  %791 = vmatpush1.bf16.msra.mxu1 %v2477_v8 }
   0xa   :  { %2323 = vmatmul.mubr.msk.bf16.vlgmr.msra.gmra.mrb[0].mxu0 %vm338_vm0, %v2478_v9  ;;  %2355 = vmatmul.mubr.msk.bf16.vlgmr.msra.gmra.mrb[0].mxu1 %vm338_vm0, %v2478_v9 }
   0xb   :  { %477 = vmatprep.mubr.bf16.mxu0 %v2566_v2  ;;  %830 = vmatprep.mubr.bf16.mxu1 %v2566_v2 }
  0x12   :  { %2324 = vmatmul.mubr.msk.bf16.gmra.mrb[4].mxu0 %vm338_vm0, %v2479_v10  ;;  %2356 = vmatmul.mubr.msk.bf16.gmra.mrb[4].mxu1 %vm338_vm0, %v2479_v10 }
  0x13   :  { %487 = vmatprep.mubr.bf16.mxu0 %v2566_v2  ;;  %840 = vmatprep.mubr.bf16.mxu1 %v2566_v2 }
  0x1a   :  { %2325 = vmatmul.mubr.msk.bf16.gmra.mrb[8].mxu0 %vm338_vm0, %v2480_v11  ;;  %2357 = vmatmul.mubr.msk.bf16.gmra.mrb[8].mxu1 %vm338_vm0, %v2480_v11 }
  0x1b   :  { %497 = vmatprep.mubr.bf16.mxu0 %v2566_v2  ;;  %850 = vmatprep.mubr.bf16.mxu1 %v2566_v2 }
  0x22   :  { %2326 = vmatmul.mubr.msk.bf16.gmra.mrb[12].mxu0 %vm338_vm0, %v2481_v12  ;;  %2358 = vmatmul.mubr.msk.bf16.gmra.mrb[12].mxu1 %vm338_vm0, %v2481_v12 }
  0x23   :  { %507 = vmatprep.mubr.bf16.mxu0 %v2566_v2  ;;  %860 = vmatprep.mubr.bf16.mxu1 %v2566_v2 }
  0x2a   :  { %2327 = vmatmul.mubr.msk.bf16.gmra.mrb[16].mxu0 %vm338_vm0, %v2482_v13  ;;  %2359 = vmatmul.mubr.msk.bf16.gmra.mrb[16].mxu1 %vm338_vm0, %v2482_v13 }
  0x2b   :  { %517 = vmatprep.mubr.bf16.mxu0 %v2566_v2  ;;  %870 = vmatprep.mubr.bf16.mxu1 %v2566_v2 }
  0x32   :  { %2328 = vmatmul.mubr.msk.bf16.gmra.mrb[20].mxu0 %vm338_vm0, %v2483_v14  ;;  %2360 = vmatmul.mubr.msk.bf16.gmra.mrb[20].mxu1 %vm338_vm0, %v2483_v14 }
  0x33   :  { %527 = vmatprep.mubr.bf16.mxu0 %v2566_v2  ;;  %880 = vmatprep.mubr.bf16.mxu1 %v2566_v2 }
  0x34   :  { %10 = vsyncpa [#allocation4], 0  ;;  %v2485_v16 = vld [vmem:[%s3354_s0 + $0x38] sm:$0xff]   ;;  %v2486_v17 = vld [vmem:[%s3354_s0 + $0x40] sm:$0xff]   ;;  %v118_v47 = vlaneseq  ;;  %vm1857_vm1 = vcmask 1041409   ;;  %vm1859_vm2 = vcmask 1042434  }
  0x35   :  { %v2487_v18 = vld [vmem:[%s3354_s0 + $0x48] sm:$0xff]   ;;  %v2488_v19 = vld [vmem:[%s3354_s0 + $0x50] sm:$0xff]   ;;  %v2489_v20 = vld [vmem:[%s3354_s0 + $0x58] sm:$0xff]   ;;  %vm1861_vm3 = vcmask 1043459   ;;  %vm1863_vm4 = vcmask 1044484   ;;  %vm1865_vm5 = vcmask 1045509  }
  0x36   :  { %v2490_v21 = vld [vmem:[%s3354_s0 + $0x60] sm:$0xff]   ;;  %v2491_v22 = vld [vmem:[%s3354_s0 + $0x68] sm:$0xff]   ;;  %v2492_v26 = vld [vmem:[%s3354_s0 + $0x70] sm:$0xff]   ;;  %v119_v48 = vshrl.u32 %v118_v47, 7  ;;  %vm1867_vm6 = vcmask 1046534   ;;  %vm1869_vm7 = vcmask 1047559  }
  0x37   :  { %v2507_v23 = vld [vmem:[%s3357_s3 + $0x40] sm:$0xff]   ;;  %v2493_v28 = vld [vmem:[%s3354_s0 + $0x78] sm:$0xff]   ;;  %v2495_v30 = vld [vmem:[%s3354_s0 + $0x88] sm:$0xff]   ;;  %s2567_s7 = smov [#allocation3]  }
  0x38   :  { %v2508_v24 = vld [vmem:[%s3357_s3] sm:$0xff]   ;;  %2420 = vmatprep.subr.bf16.mxu0 %v2507_v23  ;;  %v2514_v31 = vld [vmem:[%s3357_s3 + $0x48] sm:$0xff]   ;;  %v2496_v34 = vld [vmem:[%s3354_s0 + $0x90] sm:$0xff]   ;;  %v120_v50 = vsub.s32 0, %v119_v48  ;;  %v128_v51 = vsub.s32 2, %v119_v48  ;;  %v124_v53 = vsub.s32 1, %v119_v48 }
  0x39   :  { %v2510_v25 = vld [vmem:[%s3357_s3 + $0xc0] sm:$0xff]   ;;  %2421 = vmatpush3.bf16.msra.mxu0 %v2508_v24  ;;  %v2515_v32 = vld [vmem:[%s3357_s3 + $0x8] sm:$0xff]   ;;  %v2497_v36 = vld [vmem:[%s3354_s0 + $0x98] sm:$0xff]   ;;  %v132_v54 = vsub.s32 3, %v119_v48  ;;  %s2269_s8 = sshll.u32 %s2567_s7, 4  ;;  %s2270_s8 = int_to_ptr.vmem [resolvable:$true] %s2269_s8 }
  0x3a   :  { %2329 = vmatmul.mubr.msk.bf16.gmra.mrb[24].mxu0 %vm338_vm0, %v2484_v15  ;;  %2361 = vmatmul.mubr.msk.bf16.gmra.mrb[24].mxu1 %vm338_vm0, %v2484_v15  ;;  %v2511_v27 = vld [vmem:[%s3357_s3 + $0x80] sm:$0xff]   ;;  %v2516_v33 = vld [vmem:[%s3357_s3 + $0xc8] sm:$0xff]   ;;  %v2500_v39 = vld [vmem:[%s3354_s0 + $0xb0] sm:$0xff]   ;;  %s2542_s9 = scalar_lea.vmem %s2270_s8, 128  ;;  %p2547_p1 = scmp.lt.s32.totalorder %s2270_s8, %s2270_s8 }
  0x3b   :  { %537 = vmatprep.mubr.bf16.mxu0 %v2566_v2  ;;  %890 = vmatprep.mubr.bf16.mxu1 %v2566_v2  ;;  %v2494_v29 = vld [vmem:[%s3354_s0 + $0x80] sm:$0xff]   ;;  %v2517_v35 = vld [vmem:[%s3357_s3 + $0x88] sm:$0xff]   ;;  %v2518_v40 = vld [vmem:[%s3357_s3 + $0x50] sm:$0xff]   ;;  %p2543_p0 = scmp.ne.s32.totalorder %s2270_s8, %s2542_s9  ;;  %p2548_p2 = scmp.lt.s32.totalorder %s2542_s9, %s2542_s9 }
  0x3c   :  { %2442 = vmatprep.subr.bf16.mxu1 %v2510_v25  ;;  %2422 = vmatprep.subr.bf16.mxu0 %v2514_v31  ;;  %v2498_v37 = vld [vmem:[%s3354_s0 + $0xa0] sm:$0xff]   ;;  %v2499_v38 = vld [vmem:[%s3354_s0 + $0xa8] sm:$0xff]   ;;  %v2520_v41 = vld [vmem:[%s3357_s3 + $0xd0] sm:$0xff]  }
  0x3d   :  { %2443 = vmatpush3.bf16.msra.mxu1 %v2511_v27  ;;  %2423 = vmatpush3.bf16.msra.mxu0 %v2515_v32  ;;  %v2519_v42 = vld [vmem:[%s3357_s3 + $0x10] sm:$0xff]   ;;  %v2501_v44 = vld [vmem:[%s3354_s0 + $0xb8] sm:$0xff]   ;;  %v2502_v45 = vld [vmem:[%s3354_s0 + $0xc0] sm:$0xff]   ;;  %p2549_p3 = por %p2548_p2, %p2547_p1 }
  0x3e   :  { %2444 = vmatprep.subr.bf16.mxu1 %v2516_v33  ;;  %v2521_v43 = vld [vmem:[%s3357_s3 + $0x90] sm:$0xff]   ;;  %2424 = vmatprep.subr.bf16.mxu0 %v2518_v40  ;;  %v2503_v46 = vld [vmem:[%s3354_s0 + $0xc8] sm:$0xff]   ;;  %v116_v52 = vld [vmem:[%s3356_s2] sm:$0xf] }
  0x3f   :  { %v2504_v49 = vld [vmem:[%s3354_s0 + $0xd0] sm:$0xff]   ;;  %v2522_v55 = vld [vmem:[%s3357_s3 + $0x58] sm:$0xff]   ;;  %v2862_v59 = vrot.slane %v116_v52, %v120_v50  ;;  %v2864_v60 = vrot.slane %v116_v52, %v128_v51  ;;  %v2866_v61 = vrot.slane %v116_v52, %v124_v53  ;;  %v2868_v62 = vrot.slane %v116_v52, %v132_v54  ;;  %p2550_p4 = pnand %p2549_p3, %p2543_p0 }
  0x40   :  { %v2524_v56 = vld [vmem:[%s3357_s3 + $0xd8] sm:$0xff]  }
  0x41   :  { %2445 = vmatpush3.bf16.msra.mxu1 %v2517_v35  ;;  %2425 = vmatpush3.bf16.msra.mxu0 %v2519_v42  ;;  %v2523_v57 = vld [vmem:[%s3357_s3 + $0x18] sm:$0xff]   ;;  %v2506_v35 = vld [vmem:[%s3354_s0 + $0xe0] sm:$0xff]  }
  0x42   :  { %2330 = vmatmul.mubr.msk.bf16.gmra.mrb[28].mxu0 %vm338_vm0, %v2485_v16  ;;  %2362 = vmatmul.mubr.msk.bf16.gmra.mrb[28].mxu1 %vm338_vm0, %v2485_v16  ;;  %v2525_v58 = vld [vmem:[%s3357_s3 + $0x98] sm:$0xff]  }
  0x43   :  { %547 = vmatprep.mubr.bf16.mxu0 %v2566_v2  ;;  %900 = vmatprep.mubr.bf16.mxu1 %v2566_v2  ;;  %v2505_v6 = vld [vmem:[%s3354_s0 + $0xd8] sm:$0xff]  }
  0x44   :  { %2446 = vmatprep.subr.bf16.mxu1 %v2520_v41  ;;  %2426 = vmatprep.subr.bf16.mxu0 %v2522_v55 }
  0x45   :  { %2447 = vmatpush3.bf16.msra.mxu1 %v2521_v43  ;;  %2427 = vmatpush3.bf16.msra.mxu0 %v2523_v57 }
  0x46   :  { %2448 = vmatprep.subr.bf16.mxu1 %v2524_v56 }
  0x49   :  { %2449 = vmatpush3.bf16.msra.mxu1 %v2525_v58 }
  0x4a   :  { %2331 = vmatmul.mubr.msk.bf16.gmra.mrb[32].mxu0 %vm338_vm0, %v2486_v17  ;;  %2363 = vmatmul.mubr.msk.bf16.gmra.mrb[32].mxu1 %vm338_vm0, %v2486_v17 }
  0x4b   :  { %557 = vmatprep.mubr.bf16.mxu0 %v2566_v2  ;;  %910 = vmatprep.mubr.bf16.mxu1 %v2566_v2 }
  0x52   :  { %2332 = vmatmul.mubr.msk.bf16.gmra.mrb[36].mxu0 %vm338_vm0, %v2487_v18  ;;  %2364 = vmatmul.mubr.msk.bf16.gmra.mrb[36].mxu1 %vm338_vm0, %v2487_v18 }
  0x53   :  { %567 = vmatprep.mubr.bf16.mxu0 %v2566_v2  ;;  %920 = vmatprep.mubr.bf16.mxu1 %v2566_v2 }
  0x5a   :  { %2333 = vmatmul.mubr.msk.bf16.gmra.mrb[40].mxu0 %vm338_vm0, %v2488_v19  ;;  %2365 = vmatmul.mubr.msk.bf16.gmra.mrb[40].mxu1 %vm338_vm0, %v2488_v19 }
  0x5b   :  { %577 = vmatprep.mubr.bf16.mxu0 %v2566_v2  ;;  %930 = vmatprep.mubr.bf16.mxu1 %v2566_v2 }
  0x62   :  { %2334 = vmatmul.mubr.msk.bf16.gmra.mrb[44].mxu0 %vm338_vm0, %v2489_v20  ;;  %2366 = vmatmul.mubr.msk.bf16.gmra.mrb[44].mxu1 %vm338_vm0, %v2489_v20 }
  0x63   :  { %587 = vmatprep.mubr.bf16.mxu0 %v2566_v2  ;;  %940 = vmatprep.mubr.bf16.mxu1 %v2566_v2 }
  0x6a   :  { %2335 = vmatmul.mubr.msk.bf16.gmra.mrb[48].mxu0 %vm338_vm0, %v2490_v21  ;;  %2367 = vmatmul.mubr.msk.bf16.gmra.mrb[48].mxu1 %vm338_vm0, %v2490_v21 }
  0x6b   :  { %597 = vmatprep.mubr.bf16.mxu0 %v2566_v2  ;;  %950 = vmatprep.mubr.bf16.mxu1 %v2566_v2 }
  0x72   :  { %2336 = vmatmul.mubr.msk.bf16.gmra.mrb[52].mxu0 %vm338_vm0, %v2491_v22  ;;  %2368 = vmatmul.mubr.msk.bf16.gmra.mrb[52].mxu1 %vm338_vm0, %v2491_v22 }
  0x73   :  { %607 = vmatprep.mubr.bf16.mxu0 %v2566_v2  ;;  %960 = vmatprep.mubr.bf16.mxu1 %v2566_v2 }
  0x7a   :  { %2337 = vmatmul.mubr.msk.bf16.gmra.mrb[56].mxu0 %vm338_vm0, %v2492_v26  ;;  %2369 = vmatmul.mubr.msk.bf16.gmra.mrb[56].mxu1 %vm338_vm0, %v2492_v26 }
  0x7b   :  { %617 = vmatprep.mubr.bf16.mxu0 %v2566_v2  ;;  %970 = vmatprep.mubr.bf16.mxu1 %v2566_v2 }
  0x82   :  { %2338 = vmatmul.mubr.msk.bf16.gmra.mrb[60].mxu0 %vm338_vm0, %v2493_v28  ;;  %2370 = vmatmul.mubr.msk.bf16.gmra.mrb[60].mxu1 %vm338_vm0, %v2493_v28 }
  0x83   :  { %627 = vmatprep.mubr.bf16.mxu0 %v2566_v2  ;;  %980 = vmatprep.mubr.bf16.mxu1 %v2566_v2 }
  0x8a   :  { %2339 = vmatmul.mubr.msk.bf16.gmra.mrb[64].mxu0 %vm338_vm0, %v2494_v29  ;;  %2371 = vmatmul.mubr.msk.bf16.gmra.mrb[64].mxu1 %vm338_vm0, %v2494_v29 }
  0x8b   :  { %637 = vmatprep.mubr.bf16.mxu0 %v2566_v2  ;;  %990 = vmatprep.mubr.bf16.mxu1 %v2566_v2 }
  0x92   :  { %2340 = vmatmul.mubr.msk.bf16.gmra.mrb[68].mxu0 %vm338_vm0, %v2495_v30  ;;  %2372 = vmatmul.mubr.msk.bf16.gmra.mrb[68].mxu1 %vm338_vm0, %v2495_v30 }
  0x93   :  { %647 = vmatprep.mubr.bf16.mxu0 %v2566_v2  ;;  %1000 = vmatprep.mubr.bf16.mxu1 %v2566_v2 }
  0x9a   :  { %2341 = vmatmul.mubr.msk.bf16.gmra.mrb[72].mxu0 %vm338_vm0, %v2496_v34  ;;  %2373 = vmatmul.mubr.msk.bf16.gmra.mrb[72].mxu1 %vm338_vm0, %v2496_v34 }
  0x9b   :  { %657 = vmatprep.mubr.bf16.mxu0 %v2566_v2  ;;  %1010 = vmatprep.mubr.bf16.mxu1 %v2566_v2 }
  0xa2   :  { %2342 = vmatmul.mubr.msk.bf16.gmra.mrb[76].mxu0 %vm338_vm0, %v2497_v36  ;;  %2374 = vmatmul.mubr.msk.bf16.gmra.mrb[76].mxu1 %vm338_vm0, %v2497_v36 }
  0xa3   :  { %667 = vmatprep.mubr.bf16.mxu0 %v2566_v2  ;;  %1020 = vmatprep.mubr.bf16.mxu1 %v2566_v2 }
  0xaa   :  { %2343 = vmatmul.mubr.msk.bf16.gmra.mrb[80].mxu0 %vm338_vm0, %v2498_v37  ;;  %2375 = vmatmul.mubr.msk.bf16.gmra.mrb[80].mxu1 %vm338_vm0, %v2498_v37 }
  0xab   :  { %677 = vmatprep.mubr.bf16.mxu0 %v2566_v2  ;;  %1030 = vmatprep.mubr.bf16.mxu1 %v2566_v2 }
  0xb2   :  { %2344 = vmatmul.mubr.msk.bf16.gmra.mrb[84].mxu0 %vm338_vm0, %v2499_v38  ;;  %2376 = vmatmul.mubr.msk.bf16.gmra.mrb[84].mxu1 %vm338_vm0, %v2499_v38 }
  0xb3   :  { %687 = vmatprep.mubr.bf16.mxu0 %v2566_v2  ;;  %1040 = vmatprep.mubr.bf16.mxu1 %v2566_v2 }
  0xba   :  { %2345 = vmatmul.mubr.msk.bf16.gmra.mrb[88].mxu0 %vm338_vm0, %v2500_v39  ;;  %2377 = vmatmul.mubr.msk.bf16.gmra.mrb[88].mxu1 %vm338_vm0, %v2500_v39 }
  0xbb   :  { %697 = vmatprep.mubr.bf16.mxu0 %v2566_v2  ;;  %1050 = vmatprep.mubr.bf16.mxu1 %v2566_v2 }
  0xc2   :  { %2346 = vmatmul.mubr.msk.bf16.gmra.mrb[92].mxu0 %vm338_vm0, %v2501_v44  ;;  %2378 = vmatmul.mubr.msk.bf16.gmra.mrb[92].mxu1 %vm338_vm0, %v2501_v44 }
  0xc3   :  { %707 = vmatprep.mubr.bf16.mxu0 %v2566_v2  ;;  %1060 = vmatprep.mubr.bf16.mxu1 %v2566_v2 }
  0xca   :  { %2347 = vmatmul.mubr.msk.bf16.gmra.mrb[96].mxu0 %vm338_vm0, %v2502_v45  ;;  %2379 = vmatmul.mubr.msk.bf16.gmra.mrb[96].mxu1 %vm338_vm0, %v2502_v45 }
  0xcb   :  { %717 = vmatprep.mubr.bf16.mxu0 %v2566_v2  ;;  %1070 = vmatprep.mubr.bf16.mxu1 %v2566_v2 }
  0xd2   :  { %2348 = vmatmul.mubr.msk.bf16.gmra.mrb[100].mxu0 %vm338_vm0, %v2503_v46  ;;  %2380 = vmatmul.mubr.msk.bf16.gmra.mrb[100].mxu1 %vm338_vm0, %v2503_v46 }
  0xd3   :  { %727 = vmatprep.mubr.bf16.mxu0 %v2566_v2  ;;  %1080 = vmatprep.mubr.bf16.mxu1 %v2566_v2 }
  0xda   :  { %2349 = vmatmul.mubr.msk.bf16.gmra.mrb[104].mxu0 %vm338_vm0, %v2504_v49  ;;  %2381 = vmatmul.mubr.msk.bf16.gmra.mrb[104].mxu1 %vm338_vm0, %v2504_v49 }
  0xdb   :  { %737 = vmatprep.mubr.bf16.mxu0 %v2566_v2  ;;  %1090 = vmatprep.mubr.bf16.mxu1 %v2566_v2 }
  0xdd   :  { %v469_v63 = vpop.f32.mrb[0].mxu0  ;;  %v822_v0 = vpop.f32.mrb[0].mxu1 }
  0xde   :  { %v470_v1 = vadd.f32 %v469_v63, %v2862_v59  ;;  %v823_v3 = vadd.f32 %v822_v0, %v2864_v60  ;;  %v471_v4 = vpop.f32.mrb[1].mxu0  ;;  %v824_v5 = vpop.f32.mrb[1].mxu1 }
  0xdf   :  { %v472_v7 = vadd.f32 %v471_v4, %v2866_v61  ;;  %v825_v8 = vadd.f32 %v824_v5, %v2868_v62  ;;  %v473_v9 = vpop.f32.mrb[2].mxu0  ;;  %v826_v10 = vpop.f32.mrb[2].mxu1 }
  0xe0   :  { %v1143_v11 = vmax.f32 %v823_v3, 0.0  ;;  %v474_v12 = vadd.f32 %v473_v9, %v2862_v59  ;;  %v827_v13 = vadd.f32 %v826_v10, %v2864_v60  ;;  %v475_v14 = vpop.f32.mrb[3].mxu0  ;;  %v828_v15 = vpop.f32.mrb[3].mxu1  ;;  %v1141_v19 = vmax.f32 %v470_v1, 0.0  ;;  %v2509_v9 = vld [vmem:[%s3354_s0 + $0xe8] sm:$0xff]  }
  0xe1   :  { %v1144_v16 = vmax.f32 %v825_v8, 0.0  ;;  %v476_v17 = vadd.f32 %v475_v14, %v2866_v61  ;;  %v829_v18 = vadd.f32 %v828_v15, %v2868_v62  ;;  %v1142_v22 = vmax.f32 %v472_v7, 0.0 }
  0xe2   :  { %v1145_v20 = vmax.f32 %v474_v12, 0.0  ;;  %v1147_v21 = vmax.f32 %v827_v13, 0.0  ;;  %2350 = vmatmul.mubr.msk.bf16.gmra.mrb[108].mxu0 %vm338_vm0, %v2505_v6  ;;  %2382 = vmatmul.mubr.msk.bf16.gmra.mrb[108].mxu1 %vm338_vm0, %v2505_v6 }
  0xe3   :  { %v1146_v23 = vmax.f32 %v476_v17, 0.0  ;;  %v1148_v24 = vmax.f32 %v829_v18, 0.0  ;;  %747 = vmatprep.mubr.bf16.mxu0 %v2566_v2  ;;  %1100 = vmatprep.mubr.bf16.mxu1 %v2566_v2 }
  0xe4   :  { %v1397_v25 = vadd.f32 %v1145_v20, %v1141_v19  ;;  %v1423_v26 = vadd.f32 %v1147_v21, %v1143_v11 }
  0xe5   :  { %v1410_v27 = vadd.f32 %v1146_v23, %v1142_v22  ;;  %v1436_v28 = vadd.f32 %v1148_v24, %v1144_v16  ;;  %v479_v29 = vpop.f32.mrb[4].mxu0  ;;  %v832_v30 = vpop.f32.mrb[4].mxu1 }
  0xe6   :  { %v480_v31 = vadd.f32 %v479_v29, %v2862_v59  ;;  %v833_v32 = vadd.f32 %v832_v30, %v2864_v60  ;;  %v481_v33 = vpop.f32.mrb[5].mxu0  ;;  %v834_v34 = vpop.f32.mrb[5].mxu1 }
  0xe7   :  { %v482_v36 = vadd.f32 %v481_v33, %v2866_v61  ;;  %v835_v37 = vadd.f32 %v834_v34, %v2868_v62  ;;  %v483_v38 = vpop.f32.mrb[6].mxu0  ;;  %v836_v39 = vpop.f32.mrb[6].mxu1 }
  0xe8   :  { %v1149_v40 = vmax.f32 %v480_v31, 0.0  ;;  %v1151_v41 = vmax.f32 %v833_v32, 0.0  ;;  %v484_v42 = vadd.f32 %v483_v38, %v2862_v59  ;;  %v837_v43 = vadd.f32 %v836_v39, %v2864_v60  ;;  %v485_v44 = vpop.f32.mrb[7].mxu0  ;;  %v838_v45 = vpop.f32.mrb[7].mxu1 }
  0xe9   :  { %v1150_v46 = vmax.f32 %v482_v36, 0.0  ;;  %v1152_v47 = vmax.f32 %v835_v37, 0.0  ;;  %v486_v48 = vadd.f32 %v485_v44, %v2866_v61  ;;  %v839_v49 = vadd.f32 %v838_v45, %v2868_v62 }
  0xea   :  { %v1398_v50 = vadd.f32 %v1397_v25, %v1149_v40  ;;  %v1424_v51 = vadd.f32 %v1423_v26, %v1151_v41  ;;  %v1153_v52 = vmax.f32 %v484_v42, 0.0  ;;  %v1155_v53 = vmax.f32 %v837_v43, 0.0  ;;  %2351 = vmatmul.mubr.msk.bf16.gmra.mrb[112].mxu0 %vm338_vm0, %v2506_v35  ;;  %2383 = vmatmul.mubr.msk.bf16.gmra.mrb[112].mxu1 %vm338_vm0, %v2506_v35  ;;  %v2512_v42 = vld [vmem:[%s3354_s0 + $0xf0] sm:$0xff]  }
  0xeb   :  { %v1411_v54 = vadd.f32 %v1410_v27, %v1150_v46  ;;  %v1437_v55 = vadd.f32 %v1436_v28, %v1152_v47  ;;  %v1154_v56 = vmax.f32 %v486_v48, 0.0  ;;  %v1156_v57 = vmax.f32 %v839_v49, 0.0  ;;  %757 = vmatprep.mubr.bf16.mxu0 %v2566_v2  ;;  %1110 = vmatprep.mubr.bf16.mxu1 %v2566_v2  ;;  %v2526_v47 = vld [vmem:[%s3357_s3 + $0x60] sm:$0xff]  }
  0xec   :  { %v1399_v58 = vadd.f32 %v1398_v50, %v1153_v52  ;;  %v1425_v63 = vadd.f32 %v1424_v51, %v1155_v53  ;;  %v2528_v48 = vld [vmem:[%s3357_s3 + $0xe0] sm:$0xff]   ;;  %2428 = vmatprep.subr.bf16.mxu0 %v2526_v47 }
  0xed   :  { %v1412_v0 = vadd.f32 %v1411_v54, %v1154_v56  ;;  %v1438_v1 = vadd.f32 %v1437_v55, %v1156_v57  ;;  %v489_v3 = vpop.f32.mrb[8].mxu0  ;;  %v842_v4 = vpop.f32.mrb[8].mxu1  ;;  %v2527_v55 = vld [vmem:[%s3357_s3 + $0x20] sm:$0xff]   ;;  %2450 = vmatprep.subr.bf16.mxu1 %v2528_v48 }
  0xee   :  { %v490_v5 = vadd.f32 %v489_v3, %v2862_v59  ;;  %v843_v6 = vadd.f32 %v842_v4, %v2864_v60  ;;  %v491_v7 = vpop.f32.mrb[9].mxu0  ;;  %v844_v8 = vpop.f32.mrb[9].mxu1  ;;  %v2529_v56 = vld [vmem:[%s3357_s3 + $0xa0] sm:$0xff]   ;;  %2429 = vmatpush3.bf16.msra.mxu0 %v2527_v55 }
  0xef   :  { %v492_v10 = vadd.f32 %v491_v7, %v2866_v61  ;;  %v845_v11 = vadd.f32 %v844_v8, %v2868_v62  ;;  %v493_v12 = vpop.f32.mrb[10].mxu0  ;;  %v846_v13 = vpop.f32.mrb[10].mxu1  ;;  %2451 = vmatpush3.bf16.msra.mxu1 %v2529_v56 }
  0xf0   :  { %v1157_v14 = vmax.f32 %v490_v5, 0.0  ;;  %v1159_v15 = vmax.f32 %v843_v6, 0.0  ;;  %v494_v16 = vadd.f32 %v493_v12, %v2862_v59  ;;  %v847_v17 = vadd.f32 %v846_v13, %v2864_v60  ;;  %v495_v18 = vpop.f32.mrb[11].mxu0  ;;  %v848_v19 = vpop.f32.mrb[11].mxu1 }
  0xf1   :  { %v1158_v20 = vmax.f32 %v492_v10, 0.0  ;;  %v1160_v21 = vmax.f32 %v845_v11, 0.0  ;;  %v496_v22 = vadd.f32 %v495_v18, %v2866_v61  ;;  %v849_v23 = vadd.f32 %v848_v19, %v2868_v62 }
  0xf2   :  { %v1400_v24 = vadd.f32 %v1399_v58, %v1157_v14  ;;  %v1426_v25 = vadd.f32 %v1425_v63, %v1159_v15  ;;  %v1161_v26 = vmax.f32 %v494_v16, 0.0  ;;  %v1163_v27 = vmax.f32 %v847_v17, 0.0  ;;  %2352 = vmatmul.mubr.msk.bf16.gmra.mrb[116].mxu0 %vm338_vm0, %v2509_v9  ;;  %2384 = vmatmul.mubr.msk.bf16.gmra.mrb[116].mxu1 %vm338_vm0, %v2509_v9 }
  0xf3   :  { %v1413_v28 = vadd.f32 %v1412_v0, %v1158_v20  ;;  %v1439_v29 = vadd.f32 %v1438_v1, %v1160_v21  ;;  %v1162_v30 = vmax.f32 %v496_v22, 0.0  ;;  %v1164_v31 = vmax.f32 %v849_v23, 0.0  ;;  %767 = vmatprep.mubr.bf16.mxu0 %v2566_v2  ;;  %1120 = vmatprep.mubr.bf16.mxu1 %v2566_v2 }
  0xf4   :  { %v1401_v32 = vadd.f32 %v1400_v24, %v1161_v26  ;;  %v1427_v33 = vadd.f32 %v1426_v25, %v1163_v27 }
  0xf5   :  { %v1414_v34 = vadd.f32 %v1413_v28, %v1162_v30  ;;  %v1440_v35 = vadd.f32 %v1439_v29, %v1164_v31  ;;  %v499_v36 = vpop.f32.mrb[12].mxu0  ;;  %v852_v37 = vpop.f32.mrb[12].mxu1 }
  0xf6   :  { %v500_v38 = vadd.f32 %v499_v36, %v2862_v59  ;;  %v853_v39 = vadd.f32 %v852_v37, %v2864_v60  ;;  %v501_v40 = vpop.f32.mrb[13].mxu0  ;;  %v854_v41 = vpop.f32.mrb[13].mxu1 }
  0xf7   :  { %v502_v43 = vadd.f32 %v501_v40, %v2866_v61  ;;  %v855_v44 = vadd.f32 %v854_v41, %v2868_v62  ;;  %v503_v45 = vpop.f32.mrb[14].mxu0  ;;  %v856_v46 = vpop.f32.mrb[14].mxu1 }
  0xf8   :  { %v1165_v49 = vmax.f32 %v500_v38, 0.0  ;;  %v1167_v50 = vmax.f32 %v853_v39, 0.0  ;;  %v504_v51 = vadd.f32 %v503_v45, %v2862_v59  ;;  %v857_v52 = vadd.f32 %v856_v46, %v2864_v60  ;;  %v505_v53 = vpop.f32.mrb[15].mxu0  ;;  %v858_v54 = vpop.f32.mrb[15].mxu1 }
  0xf9   :  { %v1166_v57 = vmax.f32 %v502_v43, 0.0  ;;  %v1168_v58 = vmax.f32 %v855_v44, 0.0  ;;  %v506_v63 = vadd.f32 %v505_v53, %v2866_v61  ;;  %v859_v0 = vadd.f32 %v858_v54, %v2868_v62 }
  0xfa   :  { %v1402_v1 = vadd.f32 %v1401_v32, %v1165_v49  ;;  %v1428_v3 = vadd.f32 %v1427_v33, %v1167_v50  ;;  %v1169_v4 = vmax.f32 %v504_v51, 0.0  ;;  %v1171_v5 = vmax.f32 %v857_v52, 0.0  ;;  %2353 = vmatmul.mubr.msk.bf16.gmra.mrb[120].mxu0 %vm338_vm0, %v2512_v42  ;;  %2385 = vmatmul.mubr.msk.bf16.gmra.mrb[120].mxu1 %vm338_vm0, %v2512_v42 }
  0xfb   :  { %v1415_v6 = vadd.f32 %v1414_v34, %v1166_v57  ;;  %v1441_v7 = vadd.f32 %v1440_v35, %v1168_v58  ;;  %v1170_v8 = vmax.f32 %v506_v63, 0.0  ;;  %v1172_v9 = vmax.f32 %v859_v0, 0.0  ;;  %777 = vmatprep.mubr.bf16.mxu0 %v2566_v2  ;;  %1130 = vmatprep.mubr.bf16.mxu1 %v2566_v2  ;;  %v2513_v2 = vld [vmem:[%s3354_s0 + $0xf8] sm:$0xff]  }
  0xfc   :  { %v1403_v10 = vadd.f32 %v1402_v1, %v1169_v4  ;;  %v1429_v11 = vadd.f32 %v1428_v3, %v1171_v5 }
  0xfd   :  { %v1416_v12 = vadd.f32 %v1415_v6, %v1170_v8  ;;  %v1442_v13 = vadd.f32 %v1441_v7, %v1172_v9  ;;  %v509_v14 = vpop.f32.mrb[16].mxu0  ;;  %v862_v15 = vpop.f32.mrb[16].mxu1 }
  0xfe   :  { %v1404_v16 = vrot.slane %v1403_v10, 4  ;;  %v1430_v17 = vrot.slane %v1429_v11, 4  ;;  %v510_v18 = vadd.f32 %v509_v14, %v2862_v59  ;;  %v863_v19 = vadd.f32 %v862_v15, %v2864_v60  ;;  %v511_v20 = vpop.f32.mrb[17].mxu0  ;;  %v864_v21 = vpop.f32.mrb[17].mxu1 }
  0xff   :  { %v1417_v22 = vrot.slane %v1416_v12, 4  ;;  %v1443_v23 = vrot.slane %v1442_v13, 4  ;;  %v512_v24 = vadd.f32 %v511_v20, %v2866_v61  ;;  %v865_v25 = vadd.f32 %v864_v21, %v2868_v62  ;;  %v513_v26 = vpop.f32.mrb[18].mxu0  ;;  %v866_v27 = vpop.f32.mrb[18].mxu1 }
 0x100   :  { %v1405_v28 = vadd.f32 %v1404_v16, %v1403_v10  ;;  %v1431_v29 = vadd.f32 %v1430_v17, %v1429_v11  ;;  %v515_v30 = vpop.f32.mrb[19].mxu0  ;;  %v868_v31 = vpop.f32.mrb[19].mxu1  ;;  %v1173_v34 = vmax.f32 %v510_v18, 0.0  ;;  %v1175_v35 = vmax.f32 %v863_v19, 0.0 }
 0x101   :  { %v1418_v32 = vadd.f32 %v1417_v22, %v1416_v12  ;;  %v1444_v33 = vadd.f32 %v1443_v23, %v1442_v13  ;;  %v514_v36 = vadd.f32 %v513_v26, %v2862_v59  ;;  %v867_v37 = vadd.f32 %v866_v27, %v2864_v60 }
 0x102   :  { %2354 = vmatmul.mubr.msk.bf16.gmra.mrb[124].mxu0 %vm338_vm0, %v2513_v2  ;;  %2386 = vmatmul.mubr.msk.bf16.gmra.mrb[124].mxu1 %vm338_vm0, %v2513_v2  ;;  %v1174_v38 = vmax.f32 %v512_v24, 0.0  ;;  %v1176_v39 = vmax.f32 %v865_v25, 0.0  ;;  %v516_v40 = vadd.f32 %v515_v30, %v2866_v61  ;;  %v869_v41 = vadd.f32 %v868_v31, %v2868_v62 }
 0x103   :  { %v1406_v42 = vrot.slane %v1405_v28, 2  ;;  %v1432_v43 = vrot.slane %v1431_v29, 2  ;;  %v1177_v44 = vmax.f32 %v514_v36, 0.0  ;;  %v1179_v45 = vmax.f32 %v867_v37, 0.0 }
 0x104   :  { %v1419_v46 = vrot.slane %v1418_v32, 2  ;;  %v1445_v47 = vrot.slane %v1444_v33, 2  ;;  %v1178_v48 = vmax.f32 %v516_v40, 0.0  ;;  %v1180_v49 = vmax.f32 %v869_v41, 0.0 }
 0x105   :  { %v519_v50 = vpop.f32.mrb[20].mxu0  ;;  %v872_v51 = vpop.f32.mrb[20].mxu1  ;;  %v1449_v52 = vadd.f32 %v1177_v44, %v1173_v34  ;;  %v1475_v53 = vadd.f32 %v1179_v45, %v1175_v35  ;;  %v2957_v0 = vadd.f32 %v1406_v42, %v1405_v28  ;;  %v2959_v1 = vadd.f32 %v1432_v43, %v1431_v29 }
 0x106   :  { %v521_v54 = vpop.f32.mrb[21].mxu0  ;;  %v874_v55 = vpop.f32.mrb[21].mxu1  ;;  %v1462_v56 = vadd.f32 %v1178_v48, %v1174_v38  ;;  %v1488_v57 = vadd.f32 %v1180_v49, %v1176_v39  ;;  %v520_v3 = vadd.f32 %v519_v50, %v2862_v59  ;;  %v873_v4 = vadd.f32 %v872_v51, %v2864_v60 }
 0x107   :  { %v523_v58 = vpop.f32.mrb[22].mxu0  ;;  %v876_v63 = vpop.f32.mrb[22].mxu1  ;;  %v2963_v7 = vadd.f32 %v1419_v46, %v1418_v32  ;;  %v2965_v8 = vadd.f32 %v1445_v47, %v1444_v33  ;;  %v522_v9 = vadd.f32 %v521_v54, %v2866_v61  ;;  %v875_v10 = vadd.f32 %v874_v55, %v2868_v62 }
 0x108   :  { %v525_v5 = vpop.f32.mrb[23].mxu0  ;;  %v878_v6 = vpop.f32.mrb[23].mxu1  ;;  %v1181_v11 = vmax.f32 %v520_v3, 0.0  ;;  %v1183_v12 = vmax.f32 %v873_v4, 0.0  ;;  %v524_v13 = vadd.f32 %v523_v58, %v2862_v59  ;;  %v877_v14 = vadd.f32 %v876_v63, %v2864_v60 }
 0x109   :  { %v1182_v15 = vmax.f32 %v522_v9, 0.0  ;;  %v1184_v16 = vmax.f32 %v875_v10, 0.0  ;;  %v526_v17 = vadd.f32 %v525_v5, %v2866_v61  ;;  %v879_v18 = vadd.f32 %v878_v6, %v2868_v62 }
 0x10a   :  { %v1450_v19 = vadd.f32 %v1449_v52, %v1181_v11  ;;  %v1476_v20 = vadd.f32 %v1475_v53, %v1183_v12  ;;  %v1185_v21 = vmax.f32 %v524_v13, 0.0  ;;  %v1187_v2 = vmax.f32 %v877_v14, 0.0 }
 0x10b   :  { %v1463_v22 = vadd.f32 %v1462_v56, %v1182_v15  ;;  %v1489_v23 = vadd.f32 %v1488_v57, %v1184_v16  ;;  %v1186_v24 = vmax.f32 %v526_v17, 0.0  ;;  %v1188_v25 = vmax.f32 %v879_v18, 0.0  ;;  %v2530_v15 = vld [vmem:[%s3357_s3 + $0x68] sm:$0xff]  }
 0x10c   :  { %v1451_v28 = vadd.f32 %v1450_v19, %v1185_v21  ;;  %v1477_v29 = vadd.f32 %v1476_v20, %v1187_v2  ;;  %v1408_v3 = vrot.slane %v2957_v0, 1  ;;  %v1434_v10 = vrot.slane %v2959_v1, 1  ;;  %v2531_v16 = vld [vmem:[%s3357_s3 + $0x28] sm:$0xff]   ;;  %2430 = vmatprep.subr.bf16.mxu0 %v2530_v15 }
 0x10d   :  { %v529_v26 = vpop.f32.mrb[24].mxu0  ;;  %v882_v27 = vpop.f32.mrb[24].mxu1  ;;  %v1464_v34 = vadd.f32 %v1463_v22, %v1186_v24  ;;  %v1490_v35 = vadd.f32 %v1489_v23, %v1188_v25  ;;  %v2532_v17 = vld [vmem:[%s3357_s3 + $0xe8] sm:$0xff]   ;;  %v1421_v18 = vrot.slane %v2963_v7, 1  ;;  %v1447_v19 = vrot.slane %v2965_v8, 1  ;;  %2431 = vmatpush3.bf16.msra.mxu0 %v2531_v16 }
 0x10e   :  { %v530_v30 = vadd.f32 %v529_v26, %v2862_v59  ;;  %v883_v31 = vadd.f32 %v882_v27, %v2864_v60  ;;  %v531_v32 = vpop.f32.mrb[25].mxu0  ;;  %v884_v33 = vpop.f32.mrb[25].mxu1  ;;  %v2533_v23 = vld [vmem:[%s3357_s3 + $0xa8] sm:$0xff]   ;;  %2452 = vmatprep.subr.bf16.mxu1 %v2532_v17 }
 0x10f   :  { %v532_v36 = vadd.f32 %v531_v32, %v2866_v61  ;;  %v885_v37 = vadd.f32 %v884_v33, %v2868_v62  ;;  %v533_v38 = vpop.f32.mrb[26].mxu0  ;;  %v886_v39 = vpop.f32.mrb[26].mxu1  ;;  %2453 = vmatpush3.bf16.msra.mxu1 %v2533_v23 }
 0x110   :  { %v1189_v40 = vmax.f32 %v530_v30, 0.0  ;;  %v1191_v41 = vmax.f32 %v883_v31, 0.0  ;;  %v534_v42 = vadd.f32 %v533_v38, %v2862_v59  ;;  %v887_v43 = vadd.f32 %v886_v39, %v2864_v60  ;;  %v535_v44 = vpop.f32.mrb[27].mxu0  ;;  %v888_v45 = vpop.f32.mrb[27].mxu1 }
 0x111   :  { %v1190_v46 = vmax.f32 %v532_v36, 0.0  ;;  %v1192_v47 = vmax.f32 %v885_v37, 0.0  ;;  %v536_v48 = vadd.f32 %v535_v44, %v2866_v61  ;;  %v889_v49 = vadd.f32 %v888_v45, %v2868_v62 }
 0x112   :  { %v1452_v50 = vadd.f32 %v1451_v28, %v1189_v40  ;;  %v1478_v51 = vadd.f32 %v1477_v29, %v1191_v41  ;;  %v1193_v52 = vmax.f32 %v534_v42, 0.0  ;;  %v1195_v53 = vmax.f32 %v887_v43, 0.0 }
 0x113   :  { %v1465_v54 = vadd.f32 %v1464_v34, %v1190_v46  ;;  %v1491_v55 = vadd.f32 %v1490_v35, %v1192_v47  ;;  %v1194_v56 = vmax.f32 %v536_v48, 0.0  ;;  %v1196_v57 = vmax.f32 %v889_v49, 0.0 }
 0x114   :  { %v1453_v58 = vadd.f32 %v1452_v50, %v1193_v52  ;;  %v1479_v63 = vadd.f32 %v1478_v51, %v1195_v53  ;;  %v3006_v42 = vadd.f32 %v1408_v3, %v2957_v0  ;;  %v3009_v43 = vadd.f32 %v1434_v10, %v2959_v1 }
 0x115   :  { %v1466_v4 = vadd.f32 %v1465_v54, %v1194_v56  ;;  %v1492_v5 = vadd.f32 %v1491_v55, %v1196_v57  ;;  %v539_v6 = vpop.f32.mrb[28].mxu0  ;;  %v892_v9 = vpop.f32.mrb[28].mxu1  ;;  %v3012_v46 = vadd.f32 %v1421_v18, %v2963_v7  ;;  %v3015_v47 = vadd.f32 %v1447_v19, %v2965_v8 }
 0x116   :  { %v540_v11 = vadd.f32 %v539_v6, %v2862_v59  ;;  %v893_v12 = vadd.f32 %v892_v9, %v2864_v60  ;;  %v541_v13 = vpop.f32.mrb[29].mxu0  ;;  %v894_v14 = vpop.f32.mrb[29].mxu1 }
 0x117   :  { %v542_v20 = vadd.f32 %v541_v13, %v2866_v61  ;;  %v895_v21 = vadd.f32 %v894_v14, %v2868_v62  ;;  %v543_v2 = vpop.f32.mrb[30].mxu0  ;;  %v896_v22 = vpop.f32.mrb[30].mxu1 }
 0x118   :  { %v1197_v24 = vmax.f32 %v540_v11, 0.0  ;;  %v1199_v25 = vmax.f32 %v893_v12, 0.0  ;;  %v544_v26 = vadd.f32 %v543_v2, %v2862_v59  ;;  %v897_v27 = vadd.f32 %v896_v22, %v2864_v60  ;;  %v545_v28 = vpop.f32.mrb[31].mxu0  ;;  %v898_v29 = vpop.f32.mrb[31].mxu1 }
 0x119   :  { %v1198_v30 = vmax.f32 %v542_v20, 0.0  ;;  %v1200_v31 = vmax.f32 %v895_v21, 0.0  ;;  %v546_v32 = vadd.f32 %v545_v28, %v2866_v61  ;;  %v899_v33 = vadd.f32 %v898_v29, %v2868_v62 }
 0x11a   :  { %v1454_v34 = vadd.f32 %v1453_v58, %v1197_v24  ;;  %v1480_v35 = vadd.f32 %v1479_v63, %v1199_v25  ;;  %v1201_v36 = vmax.f32 %v544_v26, 0.0  ;;  %v1203_v37 = vmax.f32 %v897_v27, 0.0 }
 0x11b   :  { %v1467_v38 = vadd.f32 %v1466_v4, %v1198_v30  ;;  %v1493_v39 = vadd.f32 %v1492_v5, %v1200_v31  ;;  %v1202_v40 = vmax.f32 %v546_v32, 0.0  ;;  %v1204_v41 = vmax.f32 %v899_v33, 0.0 }
 0x11c   :  { %v1455_v44 = vadd.f32 %v1454_v34, %v1201_v36  ;;  %v1481_v45 = vadd.f32 %v1480_v35, %v1203_v37 }
 0x11d   :  { %v1468_v48 = vadd.f32 %v1467_v38, %v1202_v40  ;;  %v1494_v49 = vadd.f32 %v1493_v39, %v1204_v41  ;;  %v549_v50 = vpop.f32.mrb[32].mxu0  ;;  %v902_v51 = vpop.f32.mrb[32].mxu1 }
 0x11e   :  { %v1456_v52 = vrot.slane %v1455_v44, 4  ;;  %v1482_v53 = vrot.slane %v1481_v45, 4  ;;  %v550_v0 = vadd.f32 %v549_v50, %v2862_v59  ;;  %v903_v54 = vadd.f32 %v902_v51, %v2864_v60  ;;  %v551_v1 = vpop.f32.mrb[33].mxu0  ;;  %v904_v55 = vpop.f32.mrb[33].mxu1 }
 0x11f   :  { %v1469_v56 = vrot.slane %v1468_v48, 4  ;;  %v1495_v57 = vrot.slane %v1494_v49, 4  ;;  %v552_v7 = vadd.f32 %v551_v1, %v2866_v61  ;;  %v905_v8 = vadd.f32 %v904_v55, %v2868_v62  ;;  %v553_v58 = vpop.f32.mrb[34].mxu0  ;;  %v906_v63 = vpop.f32.mrb[34].mxu1 }
 0x120   :  { %v1457_v3 = vadd.f32 %v1456_v52, %v1455_v44  ;;  %v1483_v4 = vadd.f32 %v1482_v53, %v1481_v45  ;;  %v1205_v5 = vmax.f32 %v550_v0, 0.0  ;;  %v1207_v6 = vmax.f32 %v903_v54, 0.0  ;;  %v555_v9 = vpop.f32.mrb[35].mxu0  ;;  %v908_v10 = vpop.f32.mrb[35].mxu1 }
 0x121   :  { %v1470_v11 = vadd.f32 %v1469_v56, %v1468_v48  ;;  %v1496_v12 = vadd.f32 %v1495_v57, %v1494_v49  ;;  %v1206_v13 = vmax.f32 %v552_v7, 0.0  ;;  %v1208_v14 = vmax.f32 %v905_v8, 0.0 }
 0x122   :  { %v1458_v15 = vrot.slane %v1457_v3, 2  ;;  %v1484_v16 = vrot.slane %v1483_v4, 2  ;;  %v554_v17 = vadd.f32 %v553_v58, %v2862_v59  ;;  %v907_v18 = vadd.f32 %v906_v63, %v2864_v60 }
 0x123   :  { %v1471_v19 = vrot.slane %v1470_v11, 2  ;;  %v1497_v20 = vrot.slane %v1496_v12, 2  ;;  %v556_v21 = vadd.f32 %v555_v9, %v2866_v61  ;;  %v909_v2 = vadd.f32 %v908_v10, %v2868_v62 }
 0x124   :  { %v1459_v22 = vadd.f32 %v1458_v15, %v1457_v3  ;;  %v1485_v23 = vadd.f32 %v1484_v16, %v1483_v4  ;;  %v1209_v24 = vmax.f32 %v554_v17, 0.0  ;;  %v1211_v25 = vmax.f32 %v907_v18, 0.0 }
 0x125   :  { %v1472_v26 = vadd.f32 %v1471_v19, %v1470_v11  ;;  %v1498_v27 = vadd.f32 %v1497_v20, %v1496_v12  ;;  %v1210_v28 = vmax.f32 %v556_v21, 0.0  ;;  %v1212_v29 = vmax.f32 %v909_v2, 0.0  ;;  %v559_v30 = vpop.f32.mrb[36].mxu0  ;;  %v912_v31 = vpop.f32.mrb[36].mxu1 }
 0x126   :  { %v1460_v32 = vrot.slane %v1459_v22, 1  ;;  %v1486_v33 = vrot.slane %v1485_v23, 1  ;;  %v1501_v34 = vadd.f32 %v1209_v24, %v1205_v5  ;;  %v1527_v35 = vadd.f32 %v1211_v25, %v1207_v6  ;;  %v561_v36 = vpop.f32.mrb[37].mxu0  ;;  %v914_v37 = vpop.f32.mrb[37].mxu1 }
 0x127   :  { %v1473_v38 = vrot.slane %v1472_v26, 1  ;;  %v1499_v39 = vrot.slane %v1498_v27, 1  ;;  %v1514_v40 = vadd.f32 %v1210_v28, %v1206_v13  ;;  %v1540_v41 = vadd.f32 %v1212_v29, %v1208_v14  ;;  %v563_v44 = vpop.f32.mrb[38].mxu0  ;;  %v916_v45 = vpop.f32.mrb[38].mxu1 }
 0x128   :  { %v1461_v48 = vadd.f32 %v1460_v32, %v1459_v22  ;;  %v1487_v49 = vadd.f32 %v1486_v33, %v1485_v23  ;;  %v560_v50 = vadd.f32 %v559_v30, %v2862_v59  ;;  %v913_v51 = vadd.f32 %v912_v31, %v2864_v60  ;;  %v565_v52 = vpop.f32.mrb[39].mxu0  ;;  %v918_v53 = vpop.f32.mrb[39].mxu1 }
 0x129   :  { %v1474_v0 = vadd.f32 %v1473_v38, %v1472_v26  ;;  %v1500_v54 = vadd.f32 %v1499_v39, %v1498_v27  ;;  %v562_v1 = vadd.f32 %v561_v36, %v2866_v61  ;;  %v915_v55 = vadd.f32 %v914_v37, %v2868_v62 }
 0x12a   :  { %v3031_v56 = vsel %vm1857_vm1, %v1461_v48, %v3006_v42  ;;  %v3035_v57 = vsel %vm1857_vm1, %v1487_v49, %v3009_v43  ;;  %v1213_v7 = vmax.f32 %v560_v50, 0.0  ;;  %v1215_v8 = vmax.f32 %v913_v51, 0.0 }
 0x12b   :  { %v3039_v58 = vsel %vm1857_vm1, %v1474_v0, %v3012_v46  ;;  %v3043_v63 = vsel %vm1857_vm1, %v1500_v54, %v3015_v47  ;;  %v1214_v3 = vmax.f32 %v562_v1, 0.0  ;;  %v1216_v4 = vmax.f32 %v915_v55, 0.0 }
 0x12c   :  { %v1502_v5 = vadd.f32 %v1501_v34, %v1213_v7  ;;  %v1528_v6 = vadd.f32 %v1527_v35, %v1215_v8  ;;  %v564_v42 = vadd.f32 %v563_v44, %v2862_v59  ;;  %v917_v9 = vadd.f32 %v916_v45, %v2864_v60 }
 0x12d   :  { %v1515_v43 = vadd.f32 %v1514_v40, %v1214_v3  ;;  %v1541_v10 = vadd.f32 %v1540_v41, %v1216_v4  ;;  %v566_v11 = vadd.f32 %v565_v52, %v2866_v61  ;;  %v919_v12 = vadd.f32 %v918_v53, %v2868_v62  ;;  %v569_v46 = vpop.f32.mrb[40].mxu0  ;;  %v922_v13 = vpop.f32.mrb[40].mxu1  ;;  %v2534_v52 = vld [vmem:[%s3357_s3 + $0x70] sm:$0xff]  }
 0x12e   :  { %v1217_v14 = vmax.f32 %v564_v42, 0.0  ;;  %v1219_v15 = vmax.f32 %v917_v9, 0.0  ;;  %v570_v47 = vadd.f32 %v569_v46, %v2862_v59  ;;  %v923_v16 = vadd.f32 %v922_v13, %v2864_v60  ;;  %v571_v17 = vpop.f32.mrb[41].mxu0  ;;  %v924_v18 = vpop.f32.mrb[41].mxu1  ;;  %v2535_v53 = vld [vmem:[%s3357_s3 + $0x30] sm:$0xff]   ;;  %2432 = vmatprep.subr.bf16.mxu0 %v2534_v52 }
 0x12f   :  { %v1218_v19 = vmax.f32 %v566_v11, 0.0  ;;  %v1220_v20 = vmax.f32 %v919_v12, 0.0  ;;  %v572_v21 = vadd.f32 %v571_v17, %v2866_v61  ;;  %v925_v2 = vadd.f32 %v924_v18, %v2868_v62  ;;  %v573_v22 = vpop.f32.mrb[42].mxu0  ;;  %v926_v23 = vpop.f32.mrb[42].mxu1  ;;  %v2536_v3 = vld [vmem:[%s3357_s3 + $0xf0] sm:$0xff]   ;;  %2433 = vmatpush3.bf16.msra.mxu0 %v2535_v53 }
 0x130   :  { %v1503_v24 = vadd.f32 %v1502_v5, %v1217_v14  ;;  %v1529_v25 = vadd.f32 %v1528_v6, %v1219_v15  ;;  %v1221_v26 = vmax.f32 %v570_v47, 0.0  ;;  %v1223_v27 = vmax.f32 %v923_v16, 0.0  ;;  %v575_v28 = vpop.f32.mrb[43].mxu0  ;;  %v928_v29 = vpop.f32.mrb[43].mxu1  ;;  %v2537_v4 = vld [vmem:[%s3357_s3 + $0xb0] sm:$0xff]   ;;  %2454 = vmatprep.subr.bf16.mxu1 %v2536_v3 }
 0x131   :  { %v1516_v30 = vadd.f32 %v1515_v43, %v1218_v19  ;;  %v1542_v31 = vadd.f32 %v1541_v10, %v1220_v20  ;;  %v1222_v32 = vmax.f32 %v572_v21, 0.0  ;;  %v1224_v33 = vmax.f32 %v925_v2, 0.0  ;;  %2455 = vmatpush3.bf16.msra.mxu1 %v2537_v4 }
 0x132   :  { %v1504_v34 = vadd.f32 %v1503_v24, %v1221_v26  ;;  %v1530_v35 = vadd.f32 %v1529_v25, %v1223_v27  ;;  %v574_v36 = vadd.f32 %v573_v22, %v2862_v59  ;;  %v927_v37 = vadd.f32 %v926_v23, %v2864_v60 }
 0x133   :  { %v1517_v38 = vadd.f32 %v1516_v30, %v1222_v32  ;;  %v1543_v39 = vadd.f32 %v1542_v31, %v1224_v33  ;;  %v576_v40 = vadd.f32 %v575_v28, %v2866_v61  ;;  %v929_v41 = vadd.f32 %v928_v29, %v2868_v62 }
 0x134   :  { %v1225_v44 = vmax.f32 %v574_v36, 0.0  ;;  %v1227_v45 = vmax.f32 %v927_v37, 0.0 }
 0x135   :  { %v1226_v48 = vmax.f32 %v576_v40, 0.0  ;;  %v1228_v49 = vmax.f32 %v929_v41, 0.0  ;;  %v579_v50 = vpop.f32.mrb[44].mxu0  ;;  %v932_v51 = vpop.f32.mrb[44].mxu1 }
 0x136   :  { %v1505_v0 = vadd.f32 %v1504_v34, %v1225_v44  ;;  %v1531_v54 = vadd.f32 %v1530_v35, %v1227_v45  ;;  %v580_v1 = vadd.f32 %v579_v50, %v2862_v59  ;;  %v933_v55 = vadd.f32 %v932_v51, %v2864_v60  ;;  %v581_v7 = vpop.f32.mrb[45].mxu0  ;;  %v934_v8 = vpop.f32.mrb[45].mxu1 }
 0x137   :  { %v1518_v5 = vadd.f32 %v1517_v38, %v1226_v48  ;;  %v1544_v6 = vadd.f32 %v1543_v39, %v1228_v49  ;;  %v582_v42 = vadd.f32 %v581_v7, %v2866_v61  ;;  %v935_v9 = vadd.f32 %v934_v8, %v2868_v62  ;;  %v583_v43 = vpop.f32.mrb[46].mxu0  ;;  %v936_v10 = vpop.f32.mrb[46].mxu1 }
 0x138   :  { %v1229_v11 = vmax.f32 %v580_v1, 0.0  ;;  %v1231_v12 = vmax.f32 %v933_v55, 0.0  ;;  %v584_v46 = vadd.f32 %v583_v43, %v2862_v59  ;;  %v937_v13 = vadd.f32 %v936_v10, %v2864_v60  ;;  %v585_v14 = vpop.f32.mrb[47].mxu0  ;;  %v938_v15 = vpop.f32.mrb[47].mxu1 }
 0x139   :  { %v1230_v47 = vmax.f32 %v582_v42, 0.0  ;;  %v1232_v16 = vmax.f32 %v935_v9, 0.0  ;;  %v586_v17 = vadd.f32 %v585_v14, %v2866_v61  ;;  %v939_v18 = vadd.f32 %v938_v15, %v2868_v62 }
 0x13a   :  { %v1506_v19 = vadd.f32 %v1505_v0, %v1229_v11  ;;  %v1532_v20 = vadd.f32 %v1531_v54, %v1231_v12  ;;  %v1233_v21 = vmax.f32 %v584_v46, 0.0  ;;  %v1235_v2 = vmax.f32 %v937_v13, 0.0 }
 0x13b   :  { %v1519_v22 = vadd.f32 %v1518_v5, %v1230_v47  ;;  %v1545_v23 = vadd.f32 %v1544_v6, %v1232_v16  ;;  %v1234_v24 = vmax.f32 %v586_v17, 0.0  ;;  %v1236_v25 = vmax.f32 %v939_v18, 0.0 }
 0x13c   :  { %v1507_v26 = vadd.f32 %v1506_v19, %v1233_v21  ;;  %v1533_v27 = vadd.f32 %v1532_v20, %v1235_v2 }
 0x13d   :  { %v1520_v28 = vadd.f32 %v1519_v22, %v1234_v24  ;;  %v1546_v29 = vadd.f32 %v1545_v23, %v1236_v25  ;;  %v589_v30 = vpop.f32.mrb[48].mxu0  ;;  %v942_v31 = vpop.f32.mrb[48].mxu1 }
 0x13e   :  { %v1508_v32 = vrot.slane %v1507_v26, 4  ;;  %v1534_v33 = vrot.slane %v1533_v27, 4  ;;  %v590_v34 = vadd.f32 %v589_v30, %v2862_v59  ;;  %v943_v35 = vadd.f32 %v942_v31, %v2864_v60  ;;  %v591_v36 = vpop.f32.mrb[49].mxu0  ;;  %v944_v37 = vpop.f32.mrb[49].mxu1 }
 0x13f   :  { %v1521_v38 = vrot.slane %v1520_v28, 4  ;;  %v1547_v39 = vrot.slane %v1546_v29, 4  ;;  %v592_v40 = vadd.f32 %v591_v36, %v2866_v61  ;;  %v945_v41 = vadd.f32 %v944_v37, %v2868_v62  ;;  %v593_v44 = vpop.f32.mrb[50].mxu0  ;;  %v946_v45 = vpop.f32.mrb[50].mxu1 }
 0x140   :  { %v1509_v48 = vadd.f32 %v1508_v32, %v1507_v26  ;;  %v1535_v49 = vadd.f32 %v1534_v33, %v1533_v27  ;;  %v1237_v50 = vmax.f32 %v590_v34, 0.0  ;;  %v1239_v51 = vmax.f32 %v943_v35, 0.0  ;;  %v595_v52 = vpop.f32.mrb[51].mxu0  ;;  %v948_v53 = vpop.f32.mrb[51].mxu1 }
 0x141   :  { %v1522_v0 = vadd.f32 %v1521_v38, %v1520_v28  ;;  %v1548_v54 = vadd.f32 %v1547_v39, %v1546_v29  ;;  %v1238_v1 = vmax.f32 %v592_v40, 0.0  ;;  %v1240_v55 = vmax.f32 %v945_v41, 0.0 }
 0x142   :  { %v1510_v7 = vrot.slane %v1509_v48, 2  ;;  %v1536_v8 = vrot.slane %v1535_v49, 2  ;;  %v594_v3 = vadd.f32 %v593_v44, %v2862_v59  ;;  %v947_v4 = vadd.f32 %v946_v45, %v2864_v60 }
 0x143   :  { %v1523_v5 = vrot.slane %v1522_v0, 2  ;;  %v1549_v6 = vrot.slane %v1548_v54, 2  ;;  %v596_v42 = vadd.f32 %v595_v52, %v2866_v61  ;;  %v949_v9 = vadd.f32 %v948_v53, %v2868_v62 }
 0x144   :  { %v1511_v43 = vadd.f32 %v1510_v7, %v1509_v48  ;;  %v1537_v10 = vadd.f32 %v1536_v8, %v1535_v49  ;;  %v1241_v11 = vmax.f32 %v594_v3, 0.0  ;;  %v1243_v12 = vmax.f32 %v947_v4, 0.0 }
 0x145   :  { %v1524_v46 = vadd.f32 %v1523_v5, %v1522_v0  ;;  %v1550_v13 = vadd.f32 %v1549_v6, %v1548_v54  ;;  %v1242_v14 = vmax.f32 %v596_v42, 0.0  ;;  %v1244_v15 = vmax.f32 %v949_v9, 0.0  ;;  %v599_v47 = vpop.f32.mrb[52].mxu0  ;;  %v952_v16 = vpop.f32.mrb[52].mxu1 }
 0x146   :  { %v1512_v17 = vrot.slane %v1511_v43, 1  ;;  %v1538_v18 = vrot.slane %v1537_v10, 1  ;;  %v1553_v19 = vadd.f32 %v1241_v11, %v1237_v50  ;;  %v1579_v20 = vadd.f32 %v1243_v12, %v1239_v51  ;;  %v601_v21 = vpop.f32.mrb[53].mxu0  ;;  %v954_v2 = vpop.f32.mrb[53].mxu1 }
 0x147   :  { %v1525_v22 = vrot.slane %v1524_v46, 1  ;;  %v1551_v23 = vrot.slane %v1550_v13, 1  ;;  %v1566_v24 = vadd.f32 %v1242_v14, %v1238_v1  ;;  %v1592_v25 = vadd.f32 %v1244_v15, %v1240_v55  ;;  %v603_v26 = vpop.f32.mrb[54].mxu0  ;;  %v956_v27 = vpop.f32.mrb[54].mxu1 }
 0x148   :  { %v1513_v28 = vadd.f32 %v1512_v17, %v1511_v43  ;;  %v1539_v29 = vadd.f32 %v1538_v18, %v1537_v10  ;;  %v600_v30 = vadd.f32 %v599_v47, %v2862_v59  ;;  %v953_v31 = vadd.f32 %v952_v16, %v2864_v60  ;;  %v605_v32 = vpop.f32.mrb[55].mxu0  ;;  %v958_v33 = vpop.f32.mrb[55].mxu1 }
 0x149   :  { %v1526_v34 = vadd.f32 %v1525_v22, %v1524_v46  ;;  %v1552_v35 = vadd.f32 %v1551_v23, %v1550_v13  ;;  %v602_v36 = vadd.f32 %v601_v21, %v2866_v61  ;;  %v955_v37 = vadd.f32 %v954_v2, %v2868_v62 }
 0x14a   :  { %v3091_v38 = vsel %vm1859_vm2, %v1513_v28, %v3031_v56  ;;  %v3095_v39 = vsel %vm1859_vm2, %v1539_v29, %v3035_v57  ;;  %v1245_v40 = vmax.f32 %v600_v30, 0.0  ;;  %v1247_v41 = vmax.f32 %v953_v31, 0.0 }
 0x14b   :  { %v3099_v44 = vsel %vm1859_vm2, %v1526_v34, %v3039_v58  ;;  %v3103_v45 = vsel %vm1859_vm2, %v1552_v35, %v3043_v63  ;;  %v1246_v48 = vmax.f32 %v602_v36, 0.0  ;;  %v1248_v49 = vmax.f32 %v955_v37, 0.0 }
 0x14c   :  { %v1554_v50 = vadd.f32 %v1553_v19, %v1245_v40  ;;  %v1580_v51 = vadd.f32 %v1579_v20, %v1247_v41  ;;  %v604_v56 = vadd.f32 %v603_v26, %v2862_v59  ;;  %v957_v52 = vadd.f32 %v956_v27, %v2864_v60 }
 0x14d   :  { %v1567_v57 = vadd.f32 %v1566_v24, %v1246_v48  ;;  %v1593_v53 = vadd.f32 %v1592_v25, %v1248_v49  ;;  %v606_v0 = vadd.f32 %v605_v32, %v2866_v61  ;;  %v959_v54 = vadd.f32 %v958_v33, %v2868_v62  ;;  %v609_v58 = vpop.f32.mrb[56].mxu0  ;;  %v962_v1 = vpop.f32.mrb[56].mxu1  ;;  %v2538_v32 = vld [vmem:[%s3357_s3 + $0x78] sm:$0xff]  }
 0x14e   :  { %v1249_v55 = vmax.f32 %v604_v56, 0.0  ;;  %v1251_v7 = vmax.f32 %v957_v52, 0.0  ;;  %v610_v63 = vadd.f32 %v609_v58, %v2862_v59  ;;  %v963_v8 = vadd.f32 %v962_v1, %v2864_v60  ;;  %v611_v3 = vpop.f32.mrb[57].mxu0  ;;  %v964_v4 = vpop.f32.mrb[57].mxu1  ;;  %v2539_v33 = vld [vmem:[%s3357_s3 + $0x38] sm:$0xff]   ;;  %2434 = vmatprep.subr.bf16.mxu0 %v2538_v32 }
 0x14f   :  { %v1250_v5 = vmax.f32 %v606_v0, 0.0  ;;  %v1252_v6 = vmax.f32 %v959_v54, 0.0  ;;  %v612_v42 = vadd.f32 %v611_v3, %v2866_v61  ;;  %v965_v9 = vadd.f32 %v964_v4, %v2868_v62  ;;  %v613_v43 = vpop.f32.mrb[58].mxu0  ;;  %v966_v10 = vpop.f32.mrb[58].mxu1  ;;  %v2540_v48 = vld [vmem:[%s3357_s3 + $0xf8] sm:$0xff]   ;;  %2435 = vmatpush3.bf16.msra.mxu0 %v2539_v33 }
 0x150   :  { %v1555_v11 = vadd.f32 %v1554_v50, %v1249_v55  ;;  %v1581_v12 = vadd.f32 %v1580_v51, %v1251_v7  ;;  %v1253_v46 = vmax.f32 %v610_v63, 0.0  ;;  %v1255_v13 = vmax.f32 %v963_v8, 0.0  ;;  %v615_v14 = vpop.f32.mrb[59].mxu0  ;;  %v968_v15 = vpop.f32.mrb[59].mxu1  ;;  %v2541_v49 = vld [vmem:[%s3357_s3 + $0xb8] sm:$0xff]   ;;  %2456 = vmatprep.subr.bf16.mxu1 %v2540_v48 }
 0x151   :  { %v1568_v47 = vadd.f32 %v1567_v57, %v1250_v5  ;;  %v1594_v16 = vadd.f32 %v1593_v53, %v1252_v6  ;;  %v1254_v17 = vmax.f32 %v612_v42, 0.0  ;;  %v1256_v18 = vmax.f32 %v965_v9, 0.0  ;;  %2457 = vmatpush3.bf16.msra.mxu1 %v2541_v49 }
 0x152   :  { %v1556_v19 = vadd.f32 %v1555_v11, %v1253_v46  ;;  %v1582_v20 = vadd.f32 %v1581_v12, %v1255_v13  ;;  %v614_v21 = vadd.f32 %v613_v43, %v2862_v59  ;;  %v967_v2 = vadd.f32 %v966_v10, %v2864_v60 }
 0x153   :  { %v1569_v22 = vadd.f32 %v1568_v47, %v1254_v17  ;;  %v1595_v23 = vadd.f32 %v1594_v16, %v1256_v18  ;;  %v616_v24 = vadd.f32 %v615_v14, %v2866_v61  ;;  %v969_v25 = vadd.f32 %v968_v15, %v2868_v62 }
 0x154   :  { %v1257_v26 = vmax.f32 %v614_v21, 0.0  ;;  %v1259_v27 = vmax.f32 %v967_v2, 0.0 }
 0x155   :  { %v1258_v28 = vmax.f32 %v616_v24, 0.0  ;;  %v1260_v29 = vmax.f32 %v969_v25, 0.0  ;;  %v619_v30 = vpop.f32.mrb[60].mxu0  ;;  %v972_v31 = vpop.f32.mrb[60].mxu1 }
 0x156   :  { %v1557_v34 = vadd.f32 %v1556_v19, %v1257_v26  ;;  %v1583_v35 = vadd.f32 %v1582_v20, %v1259_v27  ;;  %v620_v36 = vadd.f32 %v619_v30, %v2862_v59  ;;  %v973_v37 = vadd.f32 %v972_v31, %v2864_v60  ;;  %v621_v40 = vpop.f32.mrb[61].mxu0  ;;  %v974_v41 = vpop.f32.mrb[61].mxu1 }
 0x157   :  { %v1570_v50 = vadd.f32 %v1569_v22, %v1258_v28  ;;  %v1596_v51 = vadd.f32 %v1595_v23, %v1260_v29  ;;  %v622_v56 = vadd.f32 %v621_v40, %v2866_v61  ;;  %v975_v52 = vadd.f32 %v974_v41, %v2868_v62  ;;  %v623_v57 = vpop.f32.mrb[62].mxu0  ;;  %v976_v53 = vpop.f32.mrb[62].mxu1 }
 0x158   :  { %v1261_v0 = vmax.f32 %v620_v36, 0.0  ;;  %v1263_v54 = vmax.f32 %v973_v37, 0.0  ;;  %v624_v58 = vadd.f32 %v623_v57, %v2862_v59  ;;  %v977_v1 = vadd.f32 %v976_v53, %v2864_v60  ;;  %v625_v55 = vpop.f32.mrb[63].mxu0  ;;  %v978_v7 = vpop.f32.mrb[63].mxu1 }
 0x159   :  { %v1262_v63 = vmax.f32 %v622_v56, 0.0  ;;  %v1264_v8 = vmax.f32 %v975_v52, 0.0  ;;  %v626_v3 = vadd.f32 %v625_v55, %v2866_v61  ;;  %v979_v4 = vadd.f32 %v978_v7, %v2868_v62 }
 0x15a   :  { %v1558_v5 = vadd.f32 %v1557_v34, %v1261_v0  ;;  %v1584_v6 = vadd.f32 %v1583_v35, %v1263_v54  ;;  %v1265_v42 = vmax.f32 %v624_v58, 0.0  ;;  %v1267_v9 = vmax.f32 %v977_v1, 0.0 }
 0x15b   :  { %v1571_v43 = vadd.f32 %v1570_v50, %v1262_v63  ;;  %v1597_v10 = vadd.f32 %v1596_v51, %v1264_v8  ;;  %v1266_v11 = vmax.f32 %v626_v3, 0.0  ;;  %v1268_v12 = vmax.f32 %v979_v4, 0.0 }
 0x15c   :  { %v1559_v46 = vadd.f32 %v1558_v5, %v1265_v42  ;;  %v1585_v13 = vadd.f32 %v1584_v6, %v1267_v9 }
 0x15d   :  { %v1572_v14 = vadd.f32 %v1571_v43, %v1266_v11  ;;  %v1598_v15 = vadd.f32 %v1597_v10, %v1268_v12  ;;  %v629_v47 = vpop.f32.mrb[64].mxu0  ;;  %v982_v16 = vpop.f32.mrb[64].mxu1 }
 0x15e   :  { %v1560_v17 = vrot.slane %v1559_v46, 4  ;;  %v1586_v18 = vrot.slane %v1585_v13, 4  ;;  %v630_v19 = vadd.f32 %v629_v47, %v2862_v59  ;;  %v983_v20 = vadd.f32 %v982_v16, %v2864_v60  ;;  %v631_v21 = vpop.f32.mrb[65].mxu0  ;;  %v984_v2 = vpop.f32.mrb[65].mxu1 }
 0x15f   :  { %v1573_v22 = vrot.slane %v1572_v14, 4  ;;  %v1599_v23 = vrot.slane %v1598_v15, 4  ;;  %v632_v24 = vadd.f32 %v631_v21, %v2866_v61  ;;  %v985_v25 = vadd.f32 %v984_v2, %v2868_v62  ;;  %v633_v26 = vpop.f32.mrb[66].mxu0  ;;  %v986_v27 = vpop.f32.mrb[66].mxu1 }
 0x160   :  { %v1561_v28 = vadd.f32 %v1560_v17, %v1559_v46  ;;  %v1587_v29 = vadd.f32 %v1586_v18, %v1585_v13  ;;  %v1269_v30 = vmax.f32 %v630_v19, 0.0  ;;  %v1271_v31 = vmax.f32 %v983_v20, 0.0  ;;  %v635_v32 = vpop.f32.mrb[67].mxu0  ;;  %v988_v33 = vpop.f32.mrb[67].mxu1 }
 0x161   :  { %v1574_v34 = vadd.f32 %v1573_v22, %v1572_v14  ;;  %v1600_v35 = vadd.f32 %v1599_v23, %v1598_v15  ;;  %v1270_v36 = vmax.f32 %v632_v24, 0.0  ;;  %v1272_v37 = vmax.f32 %v985_v25, 0.0 }
 0x162   :  { %v1562_v40 = vrot.slane %v1561_v28, 2  ;;  %v1588_v41 = vrot.slane %v1587_v29, 2  ;;  %v634_v48 = vadd.f32 %v633_v26, %v2862_v59  ;;  %v987_v49 = vadd.f32 %v986_v27, %v2864_v60 }
 0x163   :  { %v1575_v50 = vrot.slane %v1574_v34, 2  ;;  %v1601_v51 = vrot.slane %v1600_v35, 2  ;;  %v636_v56 = vadd.f32 %v635_v32, %v2866_v61  ;;  %v989_v52 = vadd.f32 %v988_v33, %v2868_v62 }
 0x164   :  { %v1563_v57 = vadd.f32 %v1562_v40, %v1561_v28  ;;  %v1589_v53 = vadd.f32 %v1588_v41, %v1587_v29  ;;  %v1273_v0 = vmax.f32 %v634_v48, 0.0  ;;  %v1275_v54 = vmax.f32 %v987_v49, 0.0 }
 0x165   :  { %v1576_v58 = vadd.f32 %v1575_v50, %v1574_v34  ;;  %v1602_v1 = vadd.f32 %v1601_v51, %v1600_v35  ;;  %v1274_v55 = vmax.f32 %v636_v56, 0.0  ;;  %v1276_v7 = vmax.f32 %v989_v52, 0.0  ;;  %v639_v63 = vpop.f32.mrb[68].mxu0  ;;  %v992_v8 = vpop.f32.mrb[68].mxu1 }
 0x166   :  { %v1564_v3 = vrot.slane %v1563_v57, 1  ;;  %v1590_v4 = vrot.slane %v1589_v53, 1  ;;  %v1605_v5 = vadd.f32 %v1273_v0, %v1269_v30  ;;  %v1631_v6 = vadd.f32 %v1275_v54, %v1271_v31  ;;  %v641_v42 = vpop.f32.mrb[69].mxu0  ;;  %v994_v9 = vpop.f32.mrb[69].mxu1 }
 0x167   :  { %v1577_v43 = vrot.slane %v1576_v58, 1  ;;  %v1603_v10 = vrot.slane %v1602_v1, 1  ;;  %v1618_v11 = vadd.f32 %v1274_v55, %v1270_v36  ;;  %v1644_v12 = vadd.f32 %v1276_v7, %v1272_v37  ;;  %v643_v46 = vpop.f32.mrb[70].mxu0  ;;  %v996_v13 = vpop.f32.mrb[70].mxu1 }
 0x168   :  { %v1565_v14 = vadd.f32 %v1564_v3, %v1563_v57  ;;  %v1591_v15 = vadd.f32 %v1590_v4, %v1589_v53  ;;  %v640_v47 = vadd.f32 %v639_v63, %v2862_v59  ;;  %v993_v16 = vadd.f32 %v992_v8, %v2864_v60  ;;  %v645_v17 = vpop.f32.mrb[71].mxu0  ;;  %v998_v18 = vpop.f32.mrb[71].mxu1 }
 0x169   :  { %v1578_v19 = vadd.f32 %v1577_v43, %v1576_v58  ;;  %v1604_v20 = vadd.f32 %v1603_v10, %v1602_v1  ;;  %v642_v21 = vadd.f32 %v641_v42, %v2866_v61  ;;  %v995_v2 = vadd.f32 %v994_v9, %v2868_v62 }
 0x16a   :  { %v3151_v22 = vsel %vm1861_vm3, %v1565_v14, %v3091_v38  ;;  %v3155_v23 = vsel %vm1861_vm3, %v1591_v15, %v3095_v39  ;;  %v1277_v24 = vmax.f32 %v640_v47, 0.0  ;;  %v1279_v25 = vmax.f32 %v993_v16, 0.0 }
 0x16b   :  { %v3159_v26 = vsel %vm1861_vm3, %v1578_v19, %v3099_v44  ;;  %v3163_v27 = vsel %vm1861_vm3, %v1604_v20, %v3103_v45  ;;  %v1278_v28 = vmax.f32 %v642_v21, 0.0  ;;  %v1280_v29 = vmax.f32 %v995_v2, 0.0 }
 0x16c   :  { %v1606_v30 = vadd.f32 %v1605_v5, %v1277_v24  ;;  %v1632_v31 = vadd.f32 %v1631_v6, %v1279_v25  ;;  %v644_v38 = vadd.f32 %v643_v46, %v2862_v59  ;;  %v997_v32 = vadd.f32 %v996_v13, %v2864_v60 }
 0x16d   :  { %v1619_v39 = vadd.f32 %v1618_v11, %v1278_v28  ;;  %v1645_v33 = vadd.f32 %v1644_v12, %v1280_v29  ;;  %v646_v34 = vadd.f32 %v645_v17, %v2866_v61  ;;  %v999_v35 = vadd.f32 %v998_v18, %v2868_v62  ;;  %v649_v44 = vpop.f32.mrb[72].mxu0  ;;  %v1002_v36 = vpop.f32.mrb[72].mxu1 }
 0x16e   :  { %v1281_v37 = vmax.f32 %v644_v38, 0.0  ;;  %v1283_v40 = vmax.f32 %v997_v32, 0.0  ;;  %v650_v45 = vadd.f32 %v649_v44, %v2862_v59  ;;  %v1003_v41 = vadd.f32 %v1002_v36, %v2864_v60  ;;  %v651_v48 = vpop.f32.mrb[73].mxu0  ;;  %v1004_v49 = vpop.f32.mrb[73].mxu1 }
 0x16f   :  { %v1282_v50 = vmax.f32 %v646_v34, 0.0  ;;  %v1284_v51 = vmax.f32 %v999_v35, 0.0  ;;  %v652_v56 = vadd.f32 %v651_v48, %v2866_v61  ;;  %v1005_v52 = vadd.f32 %v1004_v49, %v2868_v62  ;;  %v653_v57 = vpop.f32.mrb[74].mxu0  ;;  %v1006_v53 = vpop.f32.mrb[74].mxu1 }
 0x170   :  { %v1607_v0 = vadd.f32 %v1606_v30, %v1281_v37  ;;  %v1633_v54 = vadd.f32 %v1632_v31, %v1283_v40  ;;  %v1285_v58 = vmax.f32 %v650_v45, 0.0  ;;  %v1287_v1 = vmax.f32 %v1003_v41, 0.0  ;;  %v655_v55 = vpop.f32.mrb[75].mxu0  ;;  %v1008_v7 = vpop.f32.mrb[75].mxu1 }
 0x171   :  { %v1620_v63 = vadd.f32 %v1619_v39, %v1282_v50  ;;  %v1646_v8 = vadd.f32 %v1645_v33, %v1284_v51  ;;  %v1286_v3 = vmax.f32 %v652_v56, 0.0  ;;  %v1288_v4 = vmax.f32 %v1005_v52, 0.0 }
 0x172   :  { %v1608_v5 = vadd.f32 %v1607_v0, %v1285_v58  ;;  %v1634_v6 = vadd.f32 %v1633_v54, %v1287_v1  ;;  %v654_v42 = vadd.f32 %v653_v57, %v2862_v59  ;;  %v1007_v9 = vadd.f32 %v1006_v53, %v2864_v60 }
 0x173   :  { %v1621_v43 = vadd.f32 %v1620_v63, %v1286_v3  ;;  %v1647_v10 = vadd.f32 %v1646_v8, %v1288_v4  ;;  %v656_v11 = vadd.f32 %v655_v55, %v2866_v61  ;;  %v1009_v12 = vadd.f32 %v1008_v7, %v2868_v62 }
 0x174   :  { %v1289_v46 = vmax.f32 %v654_v42, 0.0  ;;  %v1291_v13 = vmax.f32 %v1007_v9, 0.0 }
 0x175   :  { %v1290_v14 = vmax.f32 %v656_v11, 0.0  ;;  %v1292_v15 = vmax.f32 %v1009_v12, 0.0  ;;  %v659_v47 = vpop.f32.mrb[76].mxu0  ;;  %v1012_v16 = vpop.f32.mrb[76].mxu1 }
 0x176   :  { %v1609_v17 = vadd.f32 %v1608_v5, %v1289_v46  ;;  %v1635_v18 = vadd.f32 %v1634_v6, %v1291_v13  ;;  %v660_v19 = vadd.f32 %v659_v47, %v2862_v59  ;;  %v1013_v20 = vadd.f32 %v1012_v16, %v2864_v60  ;;  %v661_v21 = vpop.f32.mrb[77].mxu0  ;;  %v1014_v2 = vpop.f32.mrb[77].mxu1 }
 0x177   :  { %v1622_v24 = vadd.f32 %v1621_v43, %v1290_v14  ;;  %v1648_v25 = vadd.f32 %v1647_v10, %v1292_v15  ;;  %v662_v28 = vadd.f32 %v661_v21, %v2866_v61  ;;  %v1015_v29 = vadd.f32 %v1014_v2, %v2868_v62  ;;  %v663_v30 = vpop.f32.mrb[78].mxu0  ;;  %v1016_v31 = vpop.f32.mrb[78].mxu1 }
 0x178   :  { %v1293_v38 = vmax.f32 %v660_v19, 0.0  ;;  %v1295_v32 = vmax.f32 %v1013_v20, 0.0  ;;  %v664_v39 = vadd.f32 %v663_v30, %v2862_v59  ;;  %v1017_v33 = vadd.f32 %v1016_v31, %v2864_v60  ;;  %v665_v34 = vpop.f32.mrb[79].mxu0  ;;  %v1018_v35 = vpop.f32.mrb[79].mxu1 }
 0x179   :  { %v1294_v44 = vmax.f32 %v662_v28, 0.0  ;;  %v1296_v36 = vmax.f32 %v1015_v29, 0.0  ;;  %v666_v37 = vadd.f32 %v665_v34, %v2866_v61  ;;  %v1019_v40 = vadd.f32 %v1018_v35, %v2868_v62 }
 0x17a   :  { %v1610_v45 = vadd.f32 %v1609_v17, %v1293_v38  ;;  %v1636_v41 = vadd.f32 %v1635_v18, %v1295_v32  ;;  %v1297_v48 = vmax.f32 %v664_v39, 0.0  ;;  %v1299_v49 = vmax.f32 %v1017_v33, 0.0 }
 0x17b   :  { %v1623_v50 = vadd.f32 %v1622_v24, %v1294_v44  ;;  %v1649_v51 = vadd.f32 %v1648_v25, %v1296_v36  ;;  %v1298_v56 = vmax.f32 %v666_v37, 0.0  ;;  %v1300_v52 = vmax.f32 %v1019_v40, 0.0 }
 0x17c   :  { %v1611_v57 = vadd.f32 %v1610_v45, %v1297_v48  ;;  %v1637_v53 = vadd.f32 %v1636_v41, %v1299_v49 }
 0x17d   :  { %v1624_v0 = vadd.f32 %v1623_v50, %v1298_v56  ;;  %v1650_v54 = vadd.f32 %v1649_v51, %v1300_v52  ;;  %v669_v58 = vpop.f32.mrb[80].mxu0  ;;  %v1022_v1 = vpop.f32.mrb[80].mxu1 }
 0x17e   :  { %v1612_v55 = vrot.slane %v1611_v57, 4  ;;  %v1638_v7 = vrot.slane %v1637_v53, 4  ;;  %v670_v63 = vadd.f32 %v669_v58, %v2862_v59  ;;  %v1023_v8 = vadd.f32 %v1022_v1, %v2864_v60  ;;  %v671_v3 = vpop.f32.mrb[81].mxu0  ;;  %v1024_v4 = vpop.f32.mrb[81].mxu1 }
 0x17f   :  { %v1625_v5 = vrot.slane %v1624_v0, 4  ;;  %v1651_v6 = vrot.slane %v1650_v54, 4  ;;  %v672_v42 = vadd.f32 %v671_v3, %v2866_v61  ;;  %v1025_v9 = vadd.f32 %v1024_v4, %v2868_v62  ;;  %v673_v43 = vpop.f32.mrb[82].mxu0  ;;  %v1026_v10 = vpop.f32.mrb[82].mxu1 }
 0x180   :  { %v1613_v11 = vadd.f32 %v1612_v55, %v1611_v57  ;;  %v1639_v12 = vadd.f32 %v1638_v7, %v1637_v53  ;;  %v1301_v46 = vmax.f32 %v670_v63, 0.0  ;;  %v1303_v13 = vmax.f32 %v1023_v8, 0.0  ;;  %v675_v14 = vpop.f32.mrb[83].mxu0  ;;  %v1028_v15 = vpop.f32.mrb[83].mxu1 }
 0x181   :  { %v1626_v47 = vadd.f32 %v1625_v5, %v1624_v0  ;;  %v1652_v16 = vadd.f32 %v1651_v6, %v1650_v54  ;;  %v1302_v17 = vmax.f32 %v672_v42, 0.0  ;;  %v1304_v18 = vmax.f32 %v1025_v9, 0.0 }
 0x182   :  { %v1614_v19 = vrot.slane %v1613_v11, 2  ;;  %v1640_v20 = vrot.slane %v1639_v12, 2  ;;  %v674_v21 = vadd.f32 %v673_v43, %v2862_v59  ;;  %v1027_v2 = vadd.f32 %v1026_v10, %v2864_v60 }
 0x183   :  { %v1627_v24 = vrot.slane %v1626_v47, 2  ;;  %v1653_v25 = vrot.slane %v1652_v16, 2  ;;  %v676_v28 = vadd.f32 %v675_v14, %v2866_v61  ;;  %v1029_v29 = vadd.f32 %v1028_v15, %v2868_v62 }
 0x184   :  { %v1615_v30 = vadd.f32 %v1614_v19, %v1613_v11  ;;  %v1641_v31 = vadd.f32 %v1640_v20, %v1639_v12  ;;  %v1305_v38 = vmax.f32 %v674_v21, 0.0  ;;  %v1307_v32 = vmax.f32 %v1027_v2, 0.0 }
 0x185   :  { %v1628_v39 = vadd.f32 %v1627_v24, %v1626_v47  ;;  %v1654_v33 = vadd.f32 %v1653_v25, %v1652_v16  ;;  %v1306_v34 = vmax.f32 %v676_v28, 0.0  ;;  %v1308_v35 = vmax.f32 %v1029_v29, 0.0  ;;  %v679_v44 = vpop.f32.mrb[84].mxu0  ;;  %v1032_v36 = vpop.f32.mrb[84].mxu1 }
 0x186   :  { %v1616_v37 = vrot.slane %v1615_v30, 1  ;;  %v1642_v40 = vrot.slane %v1641_v31, 1  ;;  %v1657_v45 = vadd.f32 %v1305_v38, %v1301_v46  ;;  %v1683_v41 = vadd.f32 %v1307_v32, %v1303_v13  ;;  %v681_v48 = vpop.f32.mrb[85].mxu0  ;;  %v1034_v49 = vpop.f32.mrb[85].mxu1 }
 0x187   :  { %v1629_v50 = vrot.slane %v1628_v39, 1  ;;  %v1655_v51 = vrot.slane %v1654_v33, 1  ;;  %v1670_v56 = vadd.f32 %v1306_v34, %v1302_v17  ;;  %v1696_v52 = vadd.f32 %v1308_v35, %v1304_v18  ;;  %v683_v57 = vpop.f32.mrb[86].mxu0  ;;  %v1036_v53 = vpop.f32.mrb[86].mxu1 }
 0x188   :  { %v1617_v0 = vadd.f32 %v1616_v37, %v1615_v30  ;;  %v1643_v54 = vadd.f32 %v1642_v40, %v1641_v31  ;;  %v680_v58 = vadd.f32 %v679_v44, %v2862_v59  ;;  %v1033_v1 = vadd.f32 %v1032_v36, %v2864_v60  ;;  %v685_v55 = vpop.f32.mrb[87].mxu0  ;;  %v1038_v7 = vpop.f32.mrb[87].mxu1 }
 0x189   :  { %v1630_v63 = vadd.f32 %v1629_v50, %v1628_v39  ;;  %v1656_v8 = vadd.f32 %v1655_v51, %v1654_v33  ;;  %v682_v3 = vadd.f32 %v681_v48, %v2866_v61  ;;  %v1035_v4 = vadd.f32 %v1034_v49, %v2868_v62 }
 0x18a   :  { %v3199_v5 = vsel %vm1863_vm4, %v1617_v0, %v3151_v22  ;;  %v3203_v6 = vsel %vm1863_vm4, %v1643_v54, %v3155_v23  ;;  %v1309_v42 = vmax.f32 %v680_v58, 0.0  ;;  %v1311_v9 = vmax.f32 %v1033_v1, 0.0 }
 0x18b   :  { %v1310_v43 = vmax.f32 %v682_v3, 0.0  ;;  %v1312_v10 = vmax.f32 %v1035_v4, 0.0  ;;  %v684_v11 = vadd.f32 %v683_v57, %v2862_v59  ;;  %v1037_v12 = vadd.f32 %v1036_v53, %v2864_v60 }
 0x18c   :  { %v1658_v46 = vadd.f32 %v1657_v45, %v1309_v42  ;;  %v1684_v13 = vadd.f32 %v1683_v41, %v1311_v9  ;;  %v686_v14 = vadd.f32 %v685_v55, %v2866_v61  ;;  %v1039_v15 = vadd.f32 %v1038_v7, %v2868_v62 }
 0x18d   :  { %v1671_v22 = vadd.f32 %v1670_v56, %v1310_v43  ;;  %v1697_v47 = vadd.f32 %v1696_v52, %v1312_v10  ;;  %v1313_v16 = vmax.f32 %v684_v11, 0.0  ;;  %v1315_v17 = vmax.f32 %v1037_v12, 0.0  ;;  %v689_v23 = vpop.f32.mrb[88].mxu0  ;;  %v1042_v18 = vpop.f32.mrb[88].mxu1 }
 0x18e   :  { %v1314_v19 = vmax.f32 %v686_v14, 0.0  ;;  %v1316_v20 = vmax.f32 %v1039_v15, 0.0  ;;  %v690_v21 = vadd.f32 %v689_v23, %v2862_v59  ;;  %v1043_v2 = vadd.f32 %v1042_v18, %v2864_v60  ;;  %v691_v24 = vpop.f32.mrb[89].mxu0  ;;  %v1044_v25 = vpop.f32.mrb[89].mxu1 }
 0x18f   :  { %v1659_v28 = vadd.f32 %v1658_v46, %v1313_v16  ;;  %v1685_v29 = vadd.f32 %v1684_v13, %v1315_v17  ;;  %v692_v30 = vadd.f32 %v691_v24, %v2866_v61  ;;  %v1045_v31 = vadd.f32 %v1044_v25, %v2868_v62  ;;  %v693_v38 = vpop.f32.mrb[90].mxu0  ;;  %v1046_v32 = vpop.f32.mrb[90].mxu1 }
 0x190   :  { %v1672_v39 = vadd.f32 %v1671_v22, %v1314_v19  ;;  %v1698_v33 = vadd.f32 %v1697_v47, %v1316_v20  ;;  %v1317_v34 = vmax.f32 %v690_v21, 0.0  ;;  %v1319_v35 = vmax.f32 %v1043_v2, 0.0  ;;  %v695_v44 = vpop.f32.mrb[91].mxu0  ;;  %v1048_v36 = vpop.f32.mrb[91].mxu1 }
 0x191   :  { %v1318_v37 = vmax.f32 %v692_v30, 0.0  ;;  %v1320_v40 = vmax.f32 %v1045_v31, 0.0  ;;  %v694_v45 = vadd.f32 %v693_v38, %v2862_v59  ;;  %v1047_v41 = vadd.f32 %v1046_v32, %v2864_v60 }
 0x192   :  { %v1660_v48 = vadd.f32 %v1659_v28, %v1317_v34  ;;  %v1686_v49 = vadd.f32 %v1685_v29, %v1319_v35  ;;  %v696_v50 = vadd.f32 %v695_v44, %v2866_v61  ;;  %v1049_v51 = vadd.f32 %v1048_v36, %v2868_v62 }
 0x193   :  { %v1673_v56 = vadd.f32 %v1672_v39, %v1318_v37  ;;  %v1699_v52 = vadd.f32 %v1698_v33, %v1320_v40  ;;  %v1321_v57 = vmax.f32 %v694_v45, 0.0  ;;  %v1323_v53 = vmax.f32 %v1047_v41, 0.0 }
 0x194   :  { %v1322_v0 = vmax.f32 %v696_v50, 0.0  ;;  %v1324_v54 = vmax.f32 %v1049_v51, 0.0  ;;  %v3219_v58 = vsel %vm1863_vm4, %v1630_v63, %v3159_v26  ;;  %v3223_v1 = vsel %vm1863_vm4, %v1656_v8, %v3163_v27 }
 0x195   :  { %v1661_v55 = vadd.f32 %v1660_v48, %v1321_v57  ;;  %v1687_v7 = vadd.f32 %v1686_v49, %v1323_v53  ;;  %v699_v3 = vpop.f32.mrb[92].mxu0  ;;  %v1052_v4 = vpop.f32.mrb[92].mxu1 }
 0x196   :  { %v1674_v42 = vadd.f32 %v1673_v56, %v1322_v0  ;;  %v1700_v9 = vadd.f32 %v1699_v52, %v1324_v54  ;;  %v700_v43 = vadd.f32 %v699_v3, %v2862_v59  ;;  %v1053_v10 = vadd.f32 %v1052_v4, %v2864_v60  ;;  %v701_v11 = vpop.f32.mrb[93].mxu0  ;;  %v1054_v12 = vpop.f32.mrb[93].mxu1 }
 0x197   :  { %v702_v46 = vadd.f32 %v701_v11, %v2866_v61  ;;  %v1055_v26 = vadd.f32 %v1054_v12, %v2868_v62  ;;  %v703_v63 = vpop.f32.mrb[94].mxu0  ;;  %v1056_v13 = vpop.f32.mrb[94].mxu1 }
 0x198   :  { %v1325_v27 = vmax.f32 %v700_v43, 0.0  ;;  %v1327_v8 = vmax.f32 %v1053_v10, 0.0  ;;  %v704_v14 = vadd.f32 %v703_v63, %v2862_v59  ;;  %v1057_v15 = vadd.f32 %v1056_v13, %v2864_v60  ;;  %v705_v22 = vpop.f32.mrb[95].mxu0  ;;  %v1058_v47 = vpop.f32.mrb[95].mxu1 }
 0x199   :  { %v1326_v16 = vmax.f32 %v702_v46, 0.0  ;;  %v1328_v17 = vmax.f32 %v1055_v26, 0.0  ;;  %v706_v23 = vadd.f32 %v705_v22, %v2866_v61  ;;  %v1059_v18 = vadd.f32 %v1058_v47, %v2868_v62 }
 0x19a   :  { %v1662_v19 = vadd.f32 %v1661_v55, %v1325_v27  ;;  %v1688_v20 = vadd.f32 %v1687_v7, %v1327_v8  ;;  %v1329_v21 = vmax.f32 %v704_v14, 0.0  ;;  %v1331_v2 = vmax.f32 %v1057_v15, 0.0 }
 0x19b   :  { %v1675_v24 = vadd.f32 %v1674_v42, %v1326_v16  ;;  %v1701_v25 = vadd.f32 %v1700_v9, %v1328_v17  ;;  %v1330_v28 = vmax.f32 %v706_v23, 0.0  ;;  %v1332_v29 = vmax.f32 %v1059_v18, 0.0 }
 0x19c   :  { %v1663_v30 = vadd.f32 %v1662_v19, %v1329_v21  ;;  %v1689_v31 = vadd.f32 %v1688_v20, %v1331_v2 }
 0x19d   :  { %v1676_v38 = vadd.f32 %v1675_v24, %v1330_v28  ;;  %v1702_v32 = vadd.f32 %v1701_v25, %v1332_v29  ;;  %v709_v39 = vpop.f32.mrb[96].mxu0  ;;  %v1062_v33 = vpop.f32.mrb[96].mxu1 }
 0x19e   :  { %v1664_v34 = vrot.slane %v1663_v30, 4  ;;  %v1690_v35 = vrot.slane %v1689_v31, 4  ;;  %v710_v44 = vadd.f32 %v709_v39, %v2862_v59  ;;  %v1063_v36 = vadd.f32 %v1062_v33, %v2864_v60  ;;  %v711_v37 = vpop.f32.mrb[97].mxu0  ;;  %v1064_v40 = vpop.f32.mrb[97].mxu1 }
 0x19f   :  { %v1677_v45 = vrot.slane %v1676_v38, 4  ;;  %v1703_v41 = vrot.slane %v1702_v32, 4  ;;  %v712_v48 = vadd.f32 %v711_v37, %v2866_v61  ;;  %v1065_v49 = vadd.f32 %v1064_v40, %v2868_v62  ;;  %v713_v50 = vpop.f32.mrb[98].mxu0  ;;  %v1066_v51 = vpop.f32.mrb[98].mxu1 }
 0x1a0   :  { %v1665_v56 = vadd.f32 %v1664_v34, %v1663_v30  ;;  %v1691_v52 = vadd.f32 %v1690_v35, %v1689_v31  ;;  %v1333_v57 = vmax.f32 %v710_v44, 0.0  ;;  %v1335_v53 = vmax.f32 %v1063_v36, 0.0  ;;  %v715_v0 = vpop.f32.mrb[99].mxu0  ;;  %v1068_v54 = vpop.f32.mrb[99].mxu1 }
 0x1a1   :  { %v1678_v55 = vadd.f32 %v1677_v45, %v1676_v38  ;;  %v1704_v7 = vadd.f32 %v1703_v41, %v1702_v32  ;;  %v1334_v3 = vmax.f32 %v712_v48, 0.0  ;;  %v1336_v4 = vmax.f32 %v1065_v49, 0.0 }
 0x1a2   :  { %v1666_v42 = vrot.slane %v1665_v56, 2  ;;  %v1692_v9 = vrot.slane %v1691_v52, 2  ;;  %v714_v43 = vadd.f32 %v713_v50, %v2862_v59  ;;  %v1067_v10 = vadd.f32 %v1066_v51, %v2864_v60 }
 0x1a3   :  { %v1679_v11 = vrot.slane %v1678_v55, 2  ;;  %v1705_v12 = vrot.slane %v1704_v7, 2  ;;  %v716_v46 = vadd.f32 %v715_v0, %v2866_v61  ;;  %v1069_v26 = vadd.f32 %v1068_v54, %v2868_v62 }
 0x1a4   :  { %v1667_v63 = vadd.f32 %v1666_v42, %v1665_v56  ;;  %v1693_v13 = vadd.f32 %v1692_v9, %v1691_v52  ;;  %v1337_v27 = vmax.f32 %v714_v43, 0.0  ;;  %v1339_v8 = vmax.f32 %v1067_v10, 0.0 }
 0x1a5   :  { %v1680_v14 = vadd.f32 %v1679_v11, %v1678_v55  ;;  %v1706_v15 = vadd.f32 %v1705_v12, %v1704_v7  ;;  %v1338_v22 = vmax.f32 %v716_v46, 0.0  ;;  %v1340_v47 = vmax.f32 %v1069_v26, 0.0  ;;  %v719_v16 = vpop.f32.mrb[100].mxu0  ;;  %v1072_v17 = vpop.f32.mrb[100].mxu1 }
 0x1a6   :  { %v1668_v23 = vrot.slane %v1667_v63, 1  ;;  %v1694_v18 = vrot.slane %v1693_v13, 1  ;;  %v1709_v19 = vadd.f32 %v1337_v27, %v1333_v57  ;;  %v1735_v20 = vadd.f32 %v1339_v8, %v1335_v53  ;;  %v721_v21 = vpop.f32.mrb[101].mxu0  ;;  %v1074_v2 = vpop.f32.mrb[101].mxu1 }
 0x1a7   :  { %v1681_v24 = vrot.slane %v1680_v14, 1  ;;  %v1707_v25 = vrot.slane %v1706_v15, 1  ;;  %v1722_v28 = vadd.f32 %v1338_v22, %v1334_v3  ;;  %v1748_v29 = vadd.f32 %v1340_v47, %v1336_v4  ;;  %v723_v30 = vpop.f32.mrb[102].mxu0  ;;  %v1076_v31 = vpop.f32.mrb[102].mxu1 }
 0x1a8   :  { %v3241_v38 = vadd.f32 %v1668_v23, %v1667_v63  ;;  %v3243_v32 = vadd.f32 %v1694_v18, %v1693_v13  ;;  %v720_v39 = vadd.f32 %v719_v16, %v2862_v59  ;;  %v1073_v33 = vadd.f32 %v1072_v17, %v2864_v60  ;;  %v725_v34 = vpop.f32.mrb[103].mxu0  ;;  %v1078_v35 = vpop.f32.mrb[103].mxu1 }
 0x1a9   :  { %v1682_v44 = vadd.f32 %v1681_v24, %v1680_v14  ;;  %v1708_v36 = vadd.f32 %v1707_v25, %v1706_v15  ;;  %v722_v37 = vadd.f32 %v721_v21, %v2866_v61  ;;  %v1075_v40 = vadd.f32 %v1074_v2, %v2868_v62 }
 0x1aa   :  { %v1341_v45 = vmax.f32 %v720_v39, 0.0  ;;  %v1343_v41 = vmax.f32 %v1073_v33, 0.0  ;;  %v724_v48 = vadd.f32 %v723_v30, %v2862_v59  ;;  %v1077_v49 = vadd.f32 %v1076_v31, %v2864_v60 }
 0x1ab   :  { %v1342_v50 = vmax.f32 %v722_v37, 0.0  ;;  %v1344_v51 = vmax.f32 %v1075_v40, 0.0  ;;  %v726_v56 = vadd.f32 %v725_v34, %v2866_v61  ;;  %v1079_v52 = vadd.f32 %v1078_v35, %v2868_v62 }
 0x1ac   :  { %v1710_v57 = vadd.f32 %v1709_v19, %v1341_v45  ;;  %v1736_v53 = vadd.f32 %v1735_v20, %v1343_v41  ;;  %v1345_v0 = vmax.f32 %v724_v48, 0.0  ;;  %v1347_v54 = vmax.f32 %v1077_v49, 0.0 }
 0x1ad   :  { %v1723_v55 = vadd.f32 %v1722_v28, %v1342_v50  ;;  %v1749_v7 = vadd.f32 %v1748_v29, %v1344_v51  ;;  %v1346_v3 = vmax.f32 %v726_v56, 0.0  ;;  %v1348_v4 = vmax.f32 %v1079_v52, 0.0  ;;  %v729_v42 = vpop.f32.mrb[104].mxu0  ;;  %v1082_v9 = vpop.f32.mrb[104].mxu1 }
 0x1ae   :  { %v1711_v43 = vadd.f32 %v1710_v57, %v1345_v0  ;;  %v1737_v10 = vadd.f32 %v1736_v53, %v1347_v54  ;;  %v730_v11 = vadd.f32 %v729_v42, %v2862_v59  ;;  %v1083_v12 = vadd.f32 %v1082_v9, %v2864_v60  ;;  %v731_v46 = vpop.f32.mrb[105].mxu0  ;;  %v1084_v26 = vpop.f32.mrb[105].mxu1 }
 0x1af   :  { %v1724_v63 = vadd.f32 %v1723_v55, %v1346_v3  ;;  %v1750_v13 = vadd.f32 %v1749_v7, %v1348_v4  ;;  %v732_v27 = vadd.f32 %v731_v46, %v2866_v61  ;;  %v1085_v8 = vadd.f32 %v1084_v26, %v2868_v62  ;;  %v733_v14 = vpop.f32.mrb[106].mxu0  ;;  %v1086_v15 = vpop.f32.mrb[106].mxu1 }
 0x1b0   :  { %v1349_v22 = vmax.f32 %v730_v11, 0.0  ;;  %v1351_v47 = vmax.f32 %v1083_v12, 0.0  ;;  %v734_v16 = vadd.f32 %v733_v14, %v2862_v59  ;;  %v1087_v17 = vadd.f32 %v1086_v15, %v2864_v60  ;;  %v735_v23 = vpop.f32.mrb[107].mxu0  ;;  %v1088_v18 = vpop.f32.mrb[107].mxu1 }
 0x1b1   :  { %v1350_v19 = vmax.f32 %v732_v27, 0.0  ;;  %v1352_v20 = vmax.f32 %v1085_v8, 0.0  ;;  %v736_v21 = vadd.f32 %v735_v23, %v2866_v61  ;;  %v1089_v2 = vadd.f32 %v1088_v18, %v2868_v62 }
 0x1b2   :  { %v1712_v24 = vadd.f32 %v1711_v43, %v1349_v22  ;;  %v1738_v25 = vadd.f32 %v1737_v10, %v1351_v47  ;;  %v1353_v28 = vmax.f32 %v734_v16, 0.0  ;;  %v1355_v29 = vmax.f32 %v1087_v17, 0.0 }
 0x1b3   :  { %v1725_v30 = vadd.f32 %v1724_v63, %v1350_v19  ;;  %v1751_v31 = vadd.f32 %v1750_v13, %v1352_v20  ;;  %v1354_v39 = vmax.f32 %v736_v21, 0.0  ;;  %v1356_v33 = vmax.f32 %v1089_v2, 0.0 }
 0x1b4   :  { %v1713_v34 = vadd.f32 %v1712_v24, %v1353_v28  ;;  %v1739_v35 = vadd.f32 %v1738_v25, %v1355_v29  ;;  %v3263_v37 = vsel %vm1865_vm5, %v1682_v44, %v3219_v58  ;;  %v3267_v40 = vsel %vm1865_vm5, %v1708_v36, %v3223_v1 }
 0x1b5   :  { %v1726_v45 = vadd.f32 %v1725_v30, %v1354_v39  ;;  %v1752_v41 = vadd.f32 %v1751_v31, %v1356_v33  ;;  %v739_v48 = vpop.f32.mrb[108].mxu0  ;;  %v1092_v49 = vpop.f32.mrb[108].mxu1  ;;  %v3272_v50 = vsel %vm1865_vm5, %v3241_v38, %v3199_v5  ;;  %v3277_v51 = vsel %vm1865_vm5, %v3243_v32, %v3203_v6 }
 0x1b6   :  { %v740_v58 = vadd.f32 %v739_v48, %v2862_v59  ;;  %v1093_v44 = vadd.f32 %v1092_v49, %v2864_v60  ;;  %v741_v1 = vpop.f32.mrb[109].mxu0  ;;  %v1094_v36 = vpop.f32.mrb[109].mxu1 }
 0x1b7   :  { %v742_v56 = vadd.f32 %v741_v1, %v2866_v61  ;;  %v1095_v52 = vadd.f32 %v1094_v36, %v2868_v62  ;;  %v743_v57 = vpop.f32.mrb[110].mxu0  ;;  %v1096_v53 = vpop.f32.mrb[110].mxu1 }
 0x1b8   :  { %v1357_v0 = vmax.f32 %v740_v58, 0.0  ;;  %v1359_v5 = vmax.f32 %v1093_v44, 0.0  ;;  %v744_v38 = vadd.f32 %v743_v57, %v2862_v59  ;;  %v1097_v54 = vadd.f32 %v1096_v53, %v2864_v60  ;;  %v745_v6 = vpop.f32.mrb[111].mxu0  ;;  %v1098_v32 = vpop.f32.mrb[111].mxu1 }
 0x1b9   :  { %v1358_v55 = vmax.f32 %v742_v56, 0.0  ;;  %v1360_v7 = vmax.f32 %v1095_v52, 0.0  ;;  %v746_v3 = vadd.f32 %v745_v6, %v2866_v61  ;;  %v1099_v4 = vadd.f32 %v1098_v32, %v2868_v62 }
 0x1ba   :  { %v1714_v42 = vadd.f32 %v1713_v34, %v1357_v0  ;;  %v1740_v9 = vadd.f32 %v1739_v35, %v1359_v5  ;;  %v1361_v43 = vmax.f32 %v744_v38, 0.0  ;;  %v1363_v10 = vmax.f32 %v1097_v54, 0.0 }
 0x1bb   :  { %v1727_v11 = vadd.f32 %v1726_v45, %v1358_v55  ;;  %v1753_v12 = vadd.f32 %v1752_v41, %v1360_v7  ;;  %v1362_v46 = vmax.f32 %v746_v3, 0.0  ;;  %v1364_v26 = vmax.f32 %v1099_v4, 0.0 }
 0x1bc   :  { %v1715_v63 = vadd.f32 %v1714_v42, %v1361_v43  ;;  %v1741_v13 = vadd.f32 %v1740_v9, %v1363_v10 }
 0x1bd   :  { %v1728_v27 = vadd.f32 %v1727_v11, %v1362_v46  ;;  %v1754_v8 = vadd.f32 %v1753_v12, %v1364_v26  ;;  %v749_v14 = vpop.f32.mrb[112].mxu0  ;;  %v1102_v15 = vpop.f32.mrb[112].mxu1 }
 0x1be   :  { %v1716_v22 = vrot.slane %v1715_v63, 4  ;;  %v1742_v47 = vrot.slane %v1741_v13, 4  ;;  %v750_v16 = vadd.f32 %v749_v14, %v2862_v59  ;;  %v1103_v17 = vadd.f32 %v1102_v15, %v2864_v60  ;;  %v751_v23 = vpop.f32.mrb[113].mxu0  ;;  %v1104_v18 = vpop.f32.mrb[113].mxu1 }
 0x1bf   :  { %v1729_v19 = vrot.slane %v1728_v27, 4  ;;  %v1755_v20 = vrot.slane %v1754_v8, 4  ;;  %v752_v21 = vadd.f32 %v751_v23, %v2866_v61  ;;  %v1105_v2 = vadd.f32 %v1104_v18, %v2868_v62  ;;  %v753_v24 = vpop.f32.mrb[114].mxu0  ;;  %v1106_v25 = vpop.f32.mrb[114].mxu1 }
 0x1c0   :  { %v1717_v28 = vadd.f32 %v1716_v22, %v1715_v63  ;;  %v1743_v29 = vadd.f32 %v1742_v47, %v1741_v13  ;;  %v1365_v30 = vmax.f32 %v750_v16, 0.0  ;;  %v1367_v31 = vmax.f32 %v1103_v17, 0.0  ;;  %v755_v39 = vpop.f32.mrb[115].mxu0  ;;  %v1108_v33 = vpop.f32.mrb[115].mxu1 }
 0x1c1   :  { %v1730_v34 = vadd.f32 %v1729_v19, %v1728_v27  ;;  %v1756_v35 = vadd.f32 %v1755_v20, %v1754_v8  ;;  %v1366_v45 = vmax.f32 %v752_v21, 0.0  ;;  %v1368_v41 = vmax.f32 %v1105_v2, 0.0 }
 0x1c2   :  { %v1718_v48 = vrot.slane %v1717_v28, 2  ;;  %v1744_v49 = vrot.slane %v1743_v29, 2  ;;  %v754_v58 = vadd.f32 %v753_v24, %v2862_v59  ;;  %v1107_v44 = vadd.f32 %v1106_v25, %v2864_v60 }
 0x1c3   :  { %v1731_v1 = vrot.slane %v1730_v34, 2  ;;  %v1757_v36 = vrot.slane %v1756_v35, 2  ;;  %v756_v56 = vadd.f32 %v755_v39, %v2866_v61  ;;  %v1109_v52 = vadd.f32 %v1108_v33, %v2868_v62 }
 0x1c4   :  { %v1719_v57 = vadd.f32 %v1718_v48, %v1717_v28  ;;  %v1745_v53 = vadd.f32 %v1744_v49, %v1743_v29  ;;  %v1369_v0 = vmax.f32 %v754_v58, 0.0  ;;  %v1371_v5 = vmax.f32 %v1107_v44, 0.0 }
 0x1c5   :  { %v1732_v38 = vadd.f32 %v1731_v1, %v1730_v34  ;;  %v1758_v54 = vadd.f32 %v1757_v36, %v1756_v35  ;;  %v1370_v6 = vmax.f32 %v756_v56, 0.0  ;;  %v1372_v32 = vmax.f32 %v1109_v52, 0.0  ;;  %v759_v55 = vpop.f32.mrb[116].mxu0  ;;  %v1112_v7 = vpop.f32.mrb[116].mxu1 }
 0x1c6   :  { %v1720_v3 = vrot.slane %v1719_v57, 1  ;;  %v1746_v4 = vrot.slane %v1745_v53, 1  ;;  %v1761_v42 = vadd.f32 %v1369_v0, %v1365_v30  ;;  %v1787_v9 = vadd.f32 %v1371_v5, %v1367_v31  ;;  %v761_v43 = vpop.f32.mrb[117].mxu0  ;;  %v1114_v10 = vpop.f32.mrb[117].mxu1 }
 0x1c7   :  { %v1733_v11 = vrot.slane %v1732_v38, 1  ;;  %v1759_v12 = vrot.slane %v1758_v54, 1  ;;  %v1774_v46 = vadd.f32 %v1370_v6, %v1366_v45  ;;  %v1800_v26 = vadd.f32 %v1372_v32, %v1368_v41  ;;  %v763_v63 = vpop.f32.mrb[118].mxu0  ;;  %v1116_v13 = vpop.f32.mrb[118].mxu1 }
 0x1c8   :  { %v3295_v27 = vadd.f32 %v1720_v3, %v1719_v57  ;;  %v3297_v8 = vadd.f32 %v1746_v4, %v1745_v53  ;;  %v760_v14 = vadd.f32 %v759_v55, %v2862_v59  ;;  %v1113_v15 = vadd.f32 %v1112_v7, %v2864_v60  ;;  %v765_v22 = vpop.f32.mrb[119].mxu0  ;;  %v1118_v47 = vpop.f32.mrb[119].mxu1 }
 0x1c9   :  { %v1734_v16 = vadd.f32 %v1733_v11, %v1732_v38  ;;  %v1760_v17 = vadd.f32 %v1759_v12, %v1758_v54  ;;  %v762_v23 = vadd.f32 %v761_v43, %v2866_v61  ;;  %v1115_v18 = vadd.f32 %v1114_v10, %v2868_v62 }
 0x1ca   :  { %v1373_v19 = vmax.f32 %v760_v14, 0.0  ;;  %v1375_v20 = vmax.f32 %v1113_v15, 0.0  ;;  %v764_v21 = vadd.f32 %v763_v63, %v2862_v59  ;;  %v1117_v2 = vadd.f32 %v1116_v13, %v2864_v60 }
 0x1cb   :  { %v1374_v24 = vmax.f32 %v762_v23, 0.0  ;;  %v1376_v25 = vmax.f32 %v1115_v18, 0.0  ;;  %v766_v28 = vadd.f32 %v765_v22, %v2866_v61  ;;  %v1119_v29 = vadd.f32 %v1118_v47, %v2868_v62 }
 0x1cc   :  { %v1762_v30 = vadd.f32 %v1761_v42, %v1373_v19  ;;  %v1788_v31 = vadd.f32 %v1787_v9, %v1375_v20  ;;  %v1377_v39 = vmax.f32 %v764_v21, 0.0  ;;  %v1379_v33 = vmax.f32 %v1117_v2, 0.0 }
 0x1cd   :  { %v1775_v34 = vadd.f32 %v1774_v46, %v1374_v24  ;;  %v1801_v35 = vadd.f32 %v1800_v26, %v1376_v25  ;;  %v1378_v45 = vmax.f32 %v766_v28, 0.0  ;;  %v1380_v41 = vmax.f32 %v1119_v29, 0.0  ;;  %v769_v48 = vpop.f32.mrb[120].mxu0  ;;  %v1122_v49 = vpop.f32.mrb[120].mxu1 }
 0x1ce   :  { %v1763_v58 = vadd.f32 %v1762_v30, %v1377_v39  ;;  %v1789_v44 = vadd.f32 %v1788_v31, %v1379_v33  ;;  %v770_v1 = vadd.f32 %v769_v48, %v2862_v59  ;;  %v1123_v36 = vadd.f32 %v1122_v49, %v2864_v60  ;;  %v771_v56 = vpop.f32.mrb[121].mxu0  ;;  %v1124_v52 = vpop.f32.mrb[121].mxu1 }
 0x1cf   :  { %v1776_v57 = vadd.f32 %v1775_v34, %v1378_v45  ;;  %v1802_v53 = vadd.f32 %v1801_v35, %v1380_v41  ;;  %v772_v0 = vadd.f32 %v771_v56, %v2866_v61  ;;  %v1125_v5 = vadd.f32 %v1124_v52, %v2868_v62  ;;  %v773_v38 = vpop.f32.mrb[122].mxu0  ;;  %v1126_v54 = vpop.f32.mrb[122].mxu1 }
 0x1d0   :  { %v1381_v6 = vmax.f32 %v770_v1, 0.0  ;;  %v1383_v32 = vmax.f32 %v1123_v36, 0.0  ;;  %v774_v55 = vadd.f32 %v773_v38, %v2862_v59  ;;  %v1127_v7 = vadd.f32 %v1126_v54, %v2864_v60  ;;  %v775_v3 = vpop.f32.mrb[123].mxu0  ;;  %v1128_v4 = vpop.f32.mrb[123].mxu1 }
 0x1d1   :  { %v1382_v42 = vmax.f32 %v772_v0, 0.0  ;;  %v1384_v9 = vmax.f32 %v1125_v5, 0.0  ;;  %v776_v43 = vadd.f32 %v775_v3, %v2866_v61  ;;  %v1129_v10 = vadd.f32 %v1128_v4, %v2868_v62 }
 0x1d2   :  { %v1764_v11 = vadd.f32 %v1763_v58, %v1381_v6  ;;  %v1790_v12 = vadd.f32 %v1789_v44, %v1383_v32  ;;  %v1385_v46 = vmax.f32 %v774_v55, 0.0  ;;  %v1387_v26 = vmax.f32 %v1127_v7, 0.0 }
 0x1d3   :  { %v1777_v63 = vadd.f32 %v1776_v57, %v1382_v42  ;;  %v1803_v13 = vadd.f32 %v1802_v53, %v1384_v9  ;;  %v1386_v14 = vmax.f32 %v776_v43, 0.0  ;;  %v1388_v15 = vmax.f32 %v1129_v10, 0.0 }
 0x1d4   :  { %v1765_v22 = vadd.f32 %v1764_v11, %v1385_v46  ;;  %v1791_v47 = vadd.f32 %v1790_v12, %v1387_v26  ;;  %v3317_v23 = vsel %vm1867_vm6, %v1734_v16, %v3263_v37  ;;  %v3321_v18 = vsel %vm1867_vm6, %v1760_v17, %v3267_v40 }
 0x1d5   :  { %v1778_v19 = vadd.f32 %v1777_v63, %v1386_v14  ;;  %v1804_v20 = vadd.f32 %v1803_v13, %v1388_v15  ;;  %v779_v21 = vpop.f32.mrb[124].mxu0  ;;  %v1132_v2 = vpop.f32.mrb[124].mxu1  ;;  %v1868_v24 = vsel %vm1867_vm6, %v3295_v27, %v3272_v50  ;;  %v1883_v25 = vsel %vm1867_vm6, %v3297_v8, %v3277_v51 }
 0x1d6   :  { %v780_v28 = vadd.f32 %v779_v21, %v2862_v59  ;;  %v1133_v37 = vadd.f32 %v1132_v2, %v2864_v60  ;;  %v781_v16 = vpop.f32.mrb[125].mxu0  ;;  %v1134_v29 = vpop.f32.mrb[125].mxu1 }
 0x1d7   :  { %v782_v40 = vadd.f32 %v781_v16, %v2866_v61  ;;  %v1135_v17 = vadd.f32 %v1134_v29, %v2868_v62  ;;  %v783_v30 = vpop.f32.mrb[126].mxu0  ;;  %v1136_v31 = vpop.f32.mrb[126].mxu1 }
 0x1d8   :  { %v1389_v39 = vmax.f32 %v780_v28, 0.0  ;;  %v1391_v33 = vmax.f32 %v1133_v37, 0.0  ;;  %v784_v50 = vadd.f32 %v783_v30, %v2862_v59  ;;  %v1137_v27 = vadd.f32 %v1136_v31, %v2864_v60  ;;  %v785_v34 = vpop.f32.mrb[127].mxu0  ;;  %v1138_v51 = vpop.f32.mrb[127].mxu1 }
 0x1d9   :  { %v1390_v8 = vmax.f32 %v782_v40, 0.0  ;;  %v1392_v35 = vmax.f32 %v1135_v17, 0.0  ;;  %v786_v45 = vadd.f32 %v785_v34, %v2866_v61  ;;  %v1139_v41 = vadd.f32 %v1138_v51, %v2868_v62 }
 0x1da   :  { %v1766_v48 = vadd.f32 %v1765_v22, %v1389_v39  ;;  %v1792_v49 = vadd.f32 %v1791_v47, %v1391_v33  ;;  %v1393_v58 = vmax.f32 %v784_v50, 0.0  ;;  %v1395_v44 = vmax.f32 %v1137_v27, 0.0 }
 0x1db   :  { %v1779_v1 = vadd.f32 %v1778_v19, %v1390_v8  ;;  %v1805_v36 = vadd.f32 %v1804_v20, %v1392_v35  ;;  %v1394_v56 = vmax.f32 %v786_v45, 0.0  ;;  %v1396_v52 = vmax.f32 %v1139_v41, 0.0 }
 0x1dc   :  { %v1767_v57 = vadd.f32 %v1766_v48, %v1393_v58  ;;  %v1793_v59 = vadd.f32 %v1792_v49, %v1395_v44 }
 0x1dd   :  { %v1780_v53 = vadd.f32 %v1779_v1, %v1394_v56  ;;  %v1806_v60 = vadd.f32 %v1805_v36, %v1396_v52 }
 0x1de   :  { %v1768_v0 = vrot.slane %v1767_v57, 4  ;;  %v1794_v5 = vrot.slane %v1793_v59, 4 }
 0x1df   :  { %v1781_v38 = vrot.slane %v1780_v53, 4  ;;  %v1807_v54 = vrot.slane %v1806_v60, 4 }
 0x1e0   :  { %v1769_v6 = vadd.f32 %v1768_v0, %v1767_v57  ;;  %v1795_v61 = vadd.f32 %v1794_v5, %v1793_v59 }
 0x1e1   :  { %v1782_v32 = vadd.f32 %v1781_v38, %v1780_v53  ;;  %v1808_v62 = vadd.f32 %v1807_v54, %v1806_v60 }
 0x1e2   :  { %v1770_v55 = vrot.slane %v1769_v6, 2  ;;  %v1796_v7 = vrot.slane %v1795_v61, 2 }
 0x1e3   :  { %v1783_v3 = vrot.slane %v1782_v32, 2  ;;  %v1809_v4 = vrot.slane %v1808_v62, 2 }
 0x1e4   :  { %v1771_v42 = vadd.f32 %v1770_v55, %v1769_v6  ;;  %v1797_v9 = vadd.f32 %v1796_v7, %v1795_v61 }
 0x1e5   :  { %v1784_v43 = vadd.f32 %v1783_v3, %v1782_v32  ;;  %v1810_v10 = vadd.f32 %v1809_v4, %v1808_v62 }
 0x1e6   :  { %v1772_v11 = vrot.slane %v1771_v42, 1  ;;  %v1798_v12 = vrot.slane %v1797_v9, 1 }
 0x1e7   :  { %v1785_v46 = vrot.slane %v1784_v43, 1  ;;  %v1811_v26 = vrot.slane %v1810_v10, 1 }
 0x1e8   :  { %v1773_v63 = vadd.f32 %v1772_v11, %v1771_v42  ;;  %v1799_v13 = vadd.f32 %v1798_v12, %v1797_v9 }
 0x1e9   :  { %v1786_v14 = vadd.f32 %v1785_v46, %v1784_v43  ;;  %v1812_v15 = vadd.f32 %v1811_v26, %v1810_v10 }
 0x1ea   :  { %v1870_v22 = vsel %vm1869_vm7, %v1773_v63, %v1868_v24  ;;  %v1884_v47 = vsel %vm1869_vm7, %v1799_v13, %v1883_v25 }
 0x1eb   :  { %v1877_v19 = vsel %vm1869_vm7, %v1786_v14, %v3317_v23  ;;  %v1891_v20 = vsel %vm1869_vm7, %v1812_v15, %v3321_v18  ;;  %v1911_v21 = vmul.f32 0.015625, %v1870_v22  ;;  %v1913_v2 = vmul.f32 0.015625, %v1884_v47  ;;  %v2387_v23 = vld [vmem:[%s3358_s4] ss:$0 sm:$0xff] }
 0x1ec   :  { %v1912_v28 = vmul.f32 0.015625, %v1877_v19  ;;  %v1914_v37 = vmul.f32 0.015625, %v1891_v20 }
 0x1ed   :  { %v1915_v40 = vpack.c.bf16 %v1911_v21, %v1911_v21  ;;  %v1917_v17 = vpack.c.bf16 %v1913_v2, %v1913_v2 }
 0x1ee   :  { %v1916_v16 = vpack.c.bf16 %v1912_v28, %v1912_v28  ;;  %v1918_v29 = vpack.c.bf16 %v1914_v37, %v1914_v37 }
 0x1f0   :  { %2214 = vmatprep.mubr.bf16.mxu0 %v1916_v16  ;;  %2254 = vmatprep.mubr.bf16.mxu1 %v1918_v29 }
 0x1f1   :  { %2215 = vmatmul.mubr.bf16.vlgmr.msra.gmra.mrb[128].mxu0 %v1915_v40  ;;  %2255 = vmatmul.mubr.bf16.vlgmr.msra.gmra.mrb[128].mxu1 %v1917_v17 }
 0x2c4   :  { %v2436_v30 = vpop.f32.mrb[128].mxu0  ;;  %v2458_v31 = vpop.f32.mrb[128].mxu1 }
 0x2c5   :  { %v2437_v24 = vpop.f32.mrb[129].mxu0  ;;  %v2459_v18 = vpop.f32.mrb[129].mxu1 }
 0x2c6   :  { %v2438_v25 = vadd.f32 %v2437_v24, %v2436_v30  ;;  %v2460_v39 = vadd.f32 %v2459_v18, %v2458_v31  ;;  %v2439_v33 = vpop.f32.mrb[130].mxu0  ;;  %v2461_v50 = vpop.f32.mrb[130].mxu1 }
 0x2c7   :  { %v2440_v27 = vpop.f32.mrb[131].mxu0  ;;  %v2462_v34 = vpop.f32.mrb[131].mxu1 }
 0x2c8   :  { %v2217_v51 = vadd.f32 %v2438_v25, %v2387_v23 }
 0x2ca   :  { %v2257_v8 = vadd.f32 %v2460_v39, %v2217_v51 }
 0x2cc   :  { %2262 = vst [vmem:[#allocation3] sm:$0xff] %v2257_v8 }
 0x2cd   :  { %2553 = shalt.err (!%p2550_p4)
}
 0x2ce   :  { %s2554_s10 = scalar_lea.hbm %s3359_s5, 128 }
 0x2cf   :  { %p2555_p5 = scmp.ne.s32.totalorder %s3359_s5, %s2554_s10  ;;  %p2558_p6 = scmp.lt.u32.totalorder %s2554_s10, %s3359_s5 }
 0x2d1   :  { %p2560_p7 = pnand %p2558_p6, %p2555_p5 }
 0x2d3   :  { %2563 = shalt.err (!%p2560_p7)
}
 0x2d4   :  { %2272 = dma.vmem_to_hbm [thread:$0]  %s2270_s8, 128, %s3359_s5, [#allocation4]  }
 0x2d5   :  { %2564 = dma.done.wait [#allocation4], 128  }
 0x2d6   :  { %2565 = vsyncadd [#allocation4], 4294967168 }
 0x2d7   :  { %2276 = vsyncpa [#allocation4], 1 }

</bundles_post_ra>
